<compile_context>
chip_gen: v6e
topology: v6e:2x2x1
jax: 0.10.0
libtpu: 0.0.40
codegen_flags: <defaults>
</compile_context>

<pallas_src>
import jax
import jax.numpy as jnp
from jax import lax
from jax.experimental import pallas as pl
from jax.experimental.pallas import tpu as pltpu
import numpy as np

# ---- problem sizes (small, consistent with the module's forward) ------------
B = 8            # batch
SRC_LEN = 8      # source sequence length
TRG_LEN = 8      # target sequence length
EMB = 32         # embedding dim
HID = 32         # LSTM hidden dim  (4*HID = 128 -> one full vreg of gates)
SRC_VOCAB = 32
TRG_VOCAB = 32   # decoder.output_dim


def seq2seq_kernel(tf_mask_ref,                       # SMEM (TRG_LEN,) int32
                   src_proj_ref,                      # VMEM (S, B, 4H) f32
                   trg_proj_ref,                      # VMEM (T, B, 4H) f32
                   enc_whh_ref, dec_whh_ref,          # VMEM (HID, 4H) f32
                   dec_in_wb_ref,                     # VMEM (TRG_VOCAB, 4H) f32
                   fc_w_ref, fc_b_ref,                # VMEM (HID,V) / (B,V) f32
                   out_ref):                          # VMEM (T, B, V) f32
    # outputs[:, 0] stays zero, exactly like the PyTorch code. Steps 1..T-1 are
    # fully overwritten below, so only slot 0 needs zeroing.
    out_ref[0] = jnp.zeros((B, TRG_VOCAB), jnp.float32)

    # ---- hoist all weights / biases out of the recurrent loops ---------------
    enc_whh = enc_whh_ref[...]        # (HID, 4H)
    dec_whh = dec_whh_ref[...]        # (HID, 4H)
    dec_in_wb = dec_in_wb_ref[...]    # (TRG_VOCAB, 4H)  = emb@Wih + b (per row)
    fc_w = fc_w_ref[...]              # (HID, TRG_VOCAB)
    fc_b = fc_b_ref[...]              # (B, TRG_VOCAB)   pre-broadcast

    def cell(xproj, h, c, whh):
        """One LSTM cell step; xproj already contains x@Wih + b_ih + b_hh.
        Gate order (i, f, g, o) matches PyTorch."""
        gates = xproj + jnp.dot(h, whh, preferred_element_type=jnp.float32)
        i = jax.nn.sigmoid(gates[:, 0 * HID:1 * HID])
        f = jax.nn.sigmoid(gates[:, 1 * HID:2 * HID])
        g = jnp.tanh(gates[:, 2 * HID:3 * HID])
        o = jax.nn.sigmoid(gates[:, 3 * HID:4 * HID])
        c_new = f * c + i * g
        h_new = o * jnp.tanh(c_new)
        return h_new, c_new

    # ---------------- encoder: run LSTM over src, keep final (h, c) ----------
    def enc_body(t, carry):
        h, c = carry
        return cell(src_proj_ref[t], h, c, enc_whh)

    h0 = jnp.zeros((B, HID), jnp.float32)
    c0 = jnp.zeros((B, HID), jnp.float32)
    h, c = lax.fori_loop(0, SRC_LEN, enc_body, (h0, c0), unroll=True)

    # iota for the greedy one-hot — hoisted (JAX does not CSE broadcasts in loops)
    lane_iota = lax.broadcasted_iota(jnp.int32, (B, TRG_VOCAB), 1)

    # ---------------- decoder: steps t = 1 .. TRG_LEN-1 -----------------------
    def dec_body(t, carry):
        h, c, xproj = carry                              # xproj: (B, 4H)
        h, c = cell(xproj, h, c, dec_whh)
        pred = jnp.dot(h, fc_w, preferred_element_type=jnp.float32) + fc_b
        out_ref[t] = pred                                # outputs[:, t] = output
        # greedy token -> its (already embedded+projected) next-step input
        top1 = jnp.argmax(pred, axis=1).astype(jnp.int32)[:, None]      # (B,1)
        greedy_oh = (lane_iota == top1).astype(jnp.float32)             # (B,V)
        greedy_proj = jnp.dot(greedy_oh, dec_in_wb,
                              preferred_element_type=jnp.float32)       # (B,4H)
        use_tf = tf_mask_ref[t] != 0                      # scalar bool (SMEM)
        xproj_next = jnp.where(use_tf, trg_proj_ref[t], greedy_proj)
        return h, c, xproj_next

    # first decoder input is trg[:, 0]  -> its precomputed projection
    lax.fori_loop(1, TRG_LEN, dec_body, (h, c, trg_proj_ref[0]), unroll=True)


def seq2seq_forward(src, trg, tf_mask, params):
    """params = (enc_emb, enc_wih, enc_whh, enc_b, dec_emb, dec_wih, dec_whh,
                 dec_b, fc_w, fc_b); all float32."""
    (enc_emb, enc_wih, enc_whh, enc_b,
     dec_emb, dec_wih, dec_whh, dec_b, fc_w, fc_b) = params

    # Fold embedding tables into the input projections (done once, in XLA):
    enc_in_w = enc_emb @ enc_wih                       # (SRC_VOCAB, 4H)
    dec_in_w = dec_emb @ dec_wih                       # (TRG_VOCAB, 4H)

    # Precompute per-step input projections (bias folded in), time-major.
    src_oh = jax.nn.one_hot(src, SRC_VOCAB, dtype=jnp.float32)   # (B, S, V)
    trg_oh = jax.nn.one_hot(trg, TRG_VOCAB, dtype=jnp.float32)   # (B, T, V)
    src_proj = jnp.einsum('bsv,vg->sbg', src_oh, enc_in_w) + enc_b   # (S,B,4H)
    trg_proj = jnp.einsum('btv,vg->tbg', trg_oh, dec_in_w) + dec_b   # (T,B,4H)

    # For the greedy path: one-hot @ (W + b) == W[top1] + b  (one-hot sums to 1)
    dec_in_wb = dec_in_w + dec_b                        # (TRG_VOCAB, 4H)
    fc_b_full = jnp.broadcast_to(fc_b, (B, TRG_VOCAB))  # pre-broadcast bias

    out_tbv = pl.pallas_call(
        seq2seq_kernel,
        out_shape=jax.ShapeDtypeStruct((TRG_LEN, B, TRG_VOCAB), jnp.float32),
        in_specs=[pl.BlockSpec(memory_space=pltpu.MemorySpace.SMEM)]
                 + [pl.BlockSpec(memory_space=pltpu.MemorySpace.VMEM)] * 7,
        out_specs=pl.BlockSpec(memory_space=pltpu.MemorySpace.VMEM),
    )(tf_mask, src_proj, trg_proj, enc_whh, dec_whh, dec_in_wb,
      fc_w, fc_b_full)
    # back to PyTorch layout (batch, trg_len, trg_vocab)
    return jnp.transpose(out_tbv, (1, 0, 2))


# ---- pure-JAX reference (same math) for a correctness check ------------------
def seq2seq_reference(src, trg, tf_mask, params):
    (enc_emb, enc_wih, enc_whh, enc_b,
     dec_emb, dec_wih, dec_whh, dec_b, fc_w, fc_b) = params

    def lstm(x, h, c, wih, whh, b):
        g = x @ wih + h @ whh + b
        i = jax.nn.sigmoid(g[:, :HID]); f = jax.nn.sigmoid(g[:, HID:2 * HID])
        gg = jnp.tanh(g[:, 2 * HID:3 * HID]); o = jax.nn.sigmoid(g[:, 3 * HID:])
        c = f * c + i * gg
        return o * jnp.tanh(c), c

    h = jnp.zeros((B, HID)); c = jnp.zeros((B, HID))
    for t in range(SRC_LEN):
        x = jax.nn.one_hot(src[:, t], SRC_VOCAB) @ enc_emb
        h, c = lstm(x, h, c, enc_wih, enc_whh, enc_b)

    outputs = jnp.zeros((B, TRG_LEN, TRG_VOCAB))
    tok = trg[:, 0]
    for t in range(1, TRG_LEN):
        x = jax.nn.one_hot(tok, TRG_VOCAB) @ dec_emb
        h, c = lstm(x, h, c, dec_wih, dec_whh, dec_b)
        pred = h @ fc_w + fc_b[0]
        outputs = outputs.at[:, t].set(pred)
        top1 = jnp.argmax(pred, axis=1).astype(jnp.int32)
        tok = jnp.where(tf_mask[t] != 0, trg[:, t], top1)
    return outputs


def make_params(key):
    ks = jax.random.split(key, 12)
    s = 0.1
    enc_emb = jax.random.normal(ks[0], (SRC_VOCAB, EMB), jnp.float32) * s
    enc_wih = jax.random.normal(ks[1], (EMB, 4 * HID), jnp.float32) * s
    enc_whh = jax.random.normal(ks[2], (HID, 4 * HID), jnp.float32) * s
    enc_b = (jax.random.normal(ks[3], (1, 4 * HID), jnp.float32) * s
             + jax.random.normal(ks[4], (1, 4 * HID), jnp.float32) * s)  # b_ih + b_hh
    dec_emb = jax.random.normal(ks[5], (TRG_VOCAB, EMB), jnp.float32) * s
    dec_wih = jax.random.normal(ks[6], (EMB, 4 * HID), jnp.float32) * s
    dec_whh = jax.random.normal(ks[7], (HID, 4 * HID), jnp.float32) * s
    dec_b = (jax.random.normal(ks[8], (1, 4 * HID), jnp.float32) * s
             + jax.random.normal(ks[9], (1, 4 * HID), jnp.float32) * s)
    fc_w = jax.random.normal(ks[10], (HID, TRG_VOCAB), jnp.float32) * s
    fc_b = jax.random.normal(ks[11], (1, TRG_VOCAB), jnp.float32) * s
    return (enc_emb, enc_wih, enc_whh, enc_b,
            dec_emb, dec_wih, dec_whh, dec_b, fc_w, fc_b)


if __name__ == "__main__":
    key = jax.random.PRNGKey(0)
    k_src, k_trg, k_tf, k_par = jax.random.split(key, 4)

    src = jax.random.randint(k_src, (B, SRC_LEN), 0, SRC_VOCAB, jnp.int32)
    trg = jax.random.randint(k_trg, (B, TRG_LEN), 0, TRG_VOCAB, jnp.int32)
    # deterministic stand-in for `random.random() < teacher_forcing_ratio`
    tf_mask = (jax.random.uniform(k_tf, (TRG_LEN,)) < 0.5).astype(jnp.int32)
    params = make_params(k_par)

    out = jax.block_until_ready(seq2seq_forward(src, trg, tf_mask, params))
    ref = jax.block_until_ready(seq2seq_reference(src, trg, tf_mask, params))

    assert out.shape == (B, TRG_LEN, TRG_VOCAB)
    # slightly relaxed vs. 1e-5: the embedding/bias folding legitimately
    # reassociates f32 sums (still far tighter than any training-relevant tol).
    np.testing.assert_allclose(np.asarray(out), np.asarray(ref),
                               rtol=1e-4, atol=1e-5)
    print("KERNEL_OK")
</pallas_src>

<mosaic_0001>
module attributes {stable_mosaic.version = 11 : i64} {
  func.func @seq2seq_kernel(%arg0: memref<8xi32, #tpu.memory_space<smem>>, %arg1: memref<8x8x128xf32, #tpu.memory_space<vmem>>, %arg2: memref<8x8x128xf32, #tpu.memory_space<vmem>>, %arg3: memref<32x128xf32, #tpu.memory_space<vmem>>, %arg4: memref<32x128xf32, #tpu.memory_space<vmem>>, %arg5: memref<32x128xf32, #tpu.memory_space<vmem>>, %arg6: memref<32x32xf32, #tpu.memory_space<vmem>>, %arg7: memref<8x32xf32, #tpu.memory_space<vmem>>, %arg8: memref<8x8x32xf32, #tpu.memory_space<vmem>>) attributes {dimension_semantics = [], scalar_prefetch = 0 : i64, scratch_operands = 0 : i64, tpu.core_type = #tpu.core_type<tc>} {
    %cst = arith.constant 0.000000e+00 : f32
    %0 = vector.broadcast %cst : f32 to vector<8x32xf32>
    %c0 = arith.constant 0 : index
    %c0_0 = arith.constant 0 : index
    %c0_1 = arith.constant 0 : index
    %1 = vector.load %arg8[%c0, %c0_0, %c0_1] : memref<8x8x32xf32, #tpu.memory_space<vmem>>, vector<1x8x32xf32>
    %2 = vector.shape_cast %1 : vector<1x8x32xf32> to vector<8x32xf32>
    %3 = vector.shape_cast %0 : vector<8x32xf32> to vector<1x8x32xf32>
    tpu.vector_store %arg8[%c0, %c0_0, %c0_1], %3 {strides = array<i32>} : memref<8x8x32xf32, #tpu.memory_space<vmem>>, vector<1x8x32xf32>,
    %c0_2 = arith.constant 0 : index
    %c0_3 = arith.constant 0 : index
    %4 = vector.load %arg3[%c0_2, %c0_3] : memref<32x128xf32, #tpu.memory_space<vmem>>, vector<32x128xf32>
    %c0_4 = arith.constant 0 : index
    %c0_5 = arith.constant 0 : index
    %5 = vector.load %arg4[%c0_4, %c0_5] : memref<32x128xf32, #tpu.memory_space<vmem>>, vector<32x128xf32>
    %c0_6 = arith.constant 0 : index
    %c0_7 = arith.constant 0 : index
    %6 = vector.load %arg5[%c0_6, %c0_7] : memref<32x128xf32, #tpu.memory_space<vmem>>, vector<32x128xf32>
    %c0_8 = arith.constant 0 : index
    %c0_9 = arith.constant 0 : index
    %7 = vector.load %arg6[%c0_8, %c0_9] : memref<32x32xf32, #tpu.memory_space<vmem>>, vector<32x32xf32>
    %c0_10 = arith.constant 0 : index
    %c0_11 = arith.constant 0 : index
    %8 = vector.load %arg7[%c0_10, %c0_11] : memref<8x32xf32, #tpu.memory_space<vmem>>, vector<8x32xf32>
    %cst_12 = arith.constant 0.000000e+00 : f32
    %9 = vector.broadcast %cst_12 : f32 to vector<8x32xf32>
    %cst_13 = arith.constant 0.000000e+00 : f32
    %10 = vector.broadcast %cst_13 : f32 to vector<8x32xf32>
    %c0_i32 = arith.constant 0 : i32
    %11 = arith.index_cast %c0_i32 : i32 to index
    %c0_14 = arith.constant 0 : index
    %c0_15 = arith.constant 0 : index
    %12 = vector.load %arg1[%11, %c0_14, %c0_15] : memref<8x8x128xf32, #tpu.memory_space<vmem>>, vector<1x8x128xf32>
    %13 = vector.shape_cast %12 : vector<1x8x128xf32> to vector<8x128xf32>
    %cst_16 = arith.constant dense<0.000000e+00> : vector<8x128xf32>
    %14 = tpu.matmul %9, %4, %cst_16 {dimension_numbers = #tpu.dot_dimension_numbers<[1], [0], [0], [1], [0, 0, 1, 1], [], []>} : vector<8x32xf32>, vector<32x128xf32>, vector<8x128xf32> -> vector<8x128xf32>
    %15 = arith.addf %13, %14 : vector<8x128xf32>
    %16 = vector.extract_strided_slice %15 {offsets = [0, 0], sizes = [8, 32], strides = [1, 1]} : vector<8x128xf32> to vector<8x32xf32>
    %17 = arith.negf %16 : vector<8x32xf32>
    %18 = math.exp %17 : vector<8x32xf32>
    %cst_17 = arith.constant 1.000000e+00 : f32
    %19 = vector.broadcast %cst_17 : f32 to vector<8x32xf32>
    %20 = arith.addf %19, %18 : vector<8x32xf32>
    %21 = arith.divf %19, %20 : vector<8x32xf32>
    %22 = vector.extract_strided_slice %15 {offsets = [0, 32], sizes = [8, 32], strides = [1, 1]} : vector<8x128xf32> to vector<8x32xf32>
    %23 = arith.negf %22 : vector<8x32xf32>
    %24 = math.exp %23 : vector<8x32xf32>
    %cst_18 = arith.constant 1.000000e+00 : f32
    %25 = vector.broadcast %cst_18 : f32 to vector<8x32xf32>
    %26 = arith.addf %25, %24 : vector<8x32xf32>
    %27 = arith.divf %25, %26 : vector<8x32xf32>
    %28 = vector.extract_strided_slice %15 {offsets = [0, 64], sizes = [8, 32], strides = [1, 1]} : vector<8x128xf32> to vector<8x32xf32>
    %29 = math.tanh %28 : vector<8x32xf32>
    %30 = vector.extract_strided_slice %15 {offsets = [0, 96], sizes = [8, 32], strides = [1, 1]} : vector<8x128xf32> to vector<8x32xf32>
    %31 = arith.negf %30 : vector<8x32xf32>
    %32 = math.exp %31 : vector<8x32xf32>
    %cst_19 = arith.constant 1.000000e+00 : f32
    %33 = vector.broadcast %cst_19 : f32 to vector<8x32xf32>
    %34 = arith.addf %33, %32 : vector<8x32xf32>
    %35 = arith.divf %33, %34 : vector<8x32xf32>
    %36 = arith.mulf %27, %10 : vector<8x32xf32>
    %37 = arith.mulf %21, %29 : vector<8x32xf32>
    %38 = arith.addf %36, %37 : vector<8x32xf32>
    %39 = math.tanh %38 : vector<8x32xf32>
    %40 = arith.mulf %35, %39 : vector<8x32xf32>
    %c1_i32 = arith.constant 1 : i32
    %41 = arith.index_cast %c1_i32 : i32 to index
    %c0_20 = arith.constant 0 : index
    %c0_21 = arith.constant 0 : index
    %42 = vector.load %arg1[%41, %c0_20, %c0_21] : memref<8x8x128xf32, #tpu.memory_space<vmem>>, vector<1x8x128xf32>
    %43 = vector.shape_cast %42 : vector<1x8x128xf32> to vector<8x128xf32>
    %cst_22 = arith.constant dense<0.000000e+00> : vector<8x128xf32>
    %44 = tpu.matmul %40, %4, %cst_22 {dimension_numbers = #tpu.dot_dimension_numbers<[1], [0], [0], [1], [0, 0, 1, 1], [], []>} : vector<8x32xf32>, vector<32x128xf32>, vector<8x128xf32> -> vector<8x128xf32>
    %45 = arith.addf %43, %44 : vector<8x128xf32>
    %46 = vector.extract_strided_slice %45 {offsets = [0, 0], sizes = [8, 32], strides = [1, 1]} : vector<8x128xf32> to vector<8x32xf32>
    %47 = arith.negf %46 : vector<8x32xf32>
    %48 = math.exp %47 : vector<8x32xf32>
    %cst_23 = arith.constant 1.000000e+00 : f32
    %49 = vector.broadcast %cst_23 : f32 to vector<8x32xf32>
    %50 = arith.addf %49, %48 : vector<8x32xf32>
    %51 = arith.divf %49, %50 : vector<8x32xf32>
    %52 = vector.extract_strided_slice %45 {offsets = [0, 32], sizes = [8, 32], strides = [1, 1]} : vector<8x128xf32> to vector<8x32xf32>
    %53 = arith.negf %52 : vector<8x32xf32>
    %54 = math.exp %53 : vector<8x32xf32>
    %cst_24 = arith.constant 1.000000e+00 : f32
    %55 = vector.broadcast %cst_24 : f32 to vector<8x32xf32>
    %56 = arith.addf %55, %54 : vector<8x32xf32>
    %57 = arith.divf %55, %56 : vector<8x32xf32>
    %58 = vector.extract_strided_slice %45 {offsets = [0, 64], sizes = [8, 32], strides = [1, 1]} : vector<8x128xf32> to vector<8x32xf32>
    %59 = math.tanh %58 : vector<8x32xf32>
    %60 = vector.extract_strided_slice %45 {offsets = [0, 96], sizes = [8, 32], strides = [1, 1]} : vector<8x128xf32> to vector<8x32xf32>
    %61 = arith.negf %60 : vector<8x32xf32>
    %62 = math.exp %61 : vector<8x32xf32>
    %cst_25 = arith.constant 1.000000e+00 : f32
    %63 = vector.broadcast %cst_25 : f32 to vector<8x32xf32>
    %64 = arith.addf %63, %62 : vector<8x32xf32>
    %65 = arith.divf %63, %64 : vector<8x32xf32>
    %66 = arith.mulf %57, %38 : vector<8x32xf32>
    %67 = arith.mulf %51, %59 : vector<8x32xf32>
    %68 = arith.addf %66, %67 : vector<8x32xf32>
    %69 = math.tanh %68 : vector<8x32xf32>
    %70 = arith.mulf %65, %69 : vector<8x32xf32>
    %c2_i32 = arith.constant 2 : i32
    %71 = arith.index_cast %c2_i32 : i32 to index
    %c0_26 = arith.constant 0 : index
    %c0_27 = arith.constant 0 : index
    %72 = vector.load %arg1[%71, %c0_26, %c0_27] : memref<8x8x128xf32, #tpu.memory_space<vmem>>, vector<1x8x128xf32>
    %73 = vector.shape_cast %72 : vector<1x8x128xf32> to vector<8x128xf32>
    %cst_28 = arith.constant dense<0.000000e+00> : vector<8x128xf32>
    %74 = tpu.matmul %70, %4, %cst_28 {dimension_numbers = #tpu.dot_dimension_numbers<[1], [0], [0], [1], [0, 0, 1, 1], [], []>} : vector<8x32xf32>, vector<32x128xf32>, vector<8x128xf32> -> vector<8x128xf32>
    %75 = arith.addf %73, %74 : vector<8x128xf32>
    %76 = vector.extract_strided_slice %75 {offsets = [0, 0], sizes = [8, 32], strides = [1, 1]} : vector<8x128xf32> to vector<8x32xf32>
    %77 = arith.negf %76 : vector<8x32xf32>
    %78 = math.exp %77 : vector<8x32xf32>
    %cst_29 = arith.constant 1.000000e+00 : f32
    %79 = vector.broadcast %cst_29 : f32 to vector<8x32xf32>
    %80 = arith.addf %79, %78 : vector<8x32xf32>
    %81 = arith.divf %79, %80 : vector<8x32xf32>
    %82 = vector.extract_strided_slice %75 {offsets = [0, 32], sizes = [8, 32], strides = [1, 1]} : vector<8x128xf32> to vector<8x32xf32>
    %83 = arith.negf %82 : vector<8x32xf32>
    %84 = math.exp %83 : vector<8x32xf32>
    %cst_30 = arith.constant 1.000000e+00 : f32
    %85 = vector.broadcast %cst_30 : f32 to vector<8x32xf32>
    %86 = arith.addf %85, %84 : vector<8x32xf32>
    %87 = arith.divf %85, %86 : vector<8x32xf32>
    %88 = vector.extract_strided_slice %75 {offsets = [0, 64], sizes = [8, 32], strides = [1, 1]} : vector<8x128xf32> to vector<8x32xf32>
    %89 = math.tanh %88 : vector<8x32xf32>
    %90 = vector.extract_strided_slice %75 {offsets = [0, 96], sizes = [8, 32], strides = [1, 1]} : vector<8x128xf32> to vector<8x32xf32>
    %91 = arith.negf %90 : vector<8x32xf32>
    %92 = math.exp %91 : vector<8x32xf32>
    %cst_31 = arith.constant 1.000000e+00 : f32
    %93 = vector.broadcast %cst_31 : f32 to vector<8x32xf32>
    %94 = arith.addf %93, %92 : vector<8x32xf32>
    %95 = arith.divf %93, %94 : vector<8x32xf32>
    %96 = arith.mulf %87, %68 : vector<8x32xf32>
    %97 = arith.mulf %81, %89 : vector<8x32xf32>
    %98 = arith.addf %96, %97 : vector<8x32xf32>
    %99 = math.tanh %98 : vector<8x32xf32>
    %100 = arith.mulf %95, %99 : vector<8x32xf32>
    %c3_i32 = arith.constant 3 : i32
    %101 = arith.index_cast %c3_i32 : i32 to index
    %c0_32 = arith.constant 0 : index
    %c0_33 = arith.constant 0 : index
    %102 = vector.load %arg1[%101, %c0_32, %c0_33] : memref<8x8x128xf32, #tpu.memory_space<vmem>>, vector<1x8x128xf32>
    %103 = vector.shape_cast %102 : vector<1x8x128xf32> to vector<8x128xf32>
    %cst_34 = arith.constant dense<0.000000e+00> : vector<8x128xf32>
    %104 = tpu.matmul %100, %4, %cst_34 {dimension_numbers = #tpu.dot_dimension_numbers<[1], [0], [0], [1], [0, 0, 1, 1], [], []>} : vector<8x32xf32>, vector<32x128xf32>, vector<8x128xf32> -> vector<8x128xf32>
    %105 = arith.addf %103, %104 : vector<8x128xf32>
    %106 = vector.extract_strided_slice %105 {offsets = [0, 0], sizes = [8, 32], strides = [1, 1]} : vector<8x128xf32> to vector<8x32xf32>
    %107 = arith.negf %106 : vector<8x32xf32>
    %108 = math.exp %107 : vector<8x32xf32>
    %cst_35 = arith.constant 1.000000e+00 : f32
    %109 = vector.broadcast %cst_35 : f32 to vector<8x32xf32>
    %110 = arith.addf %109, %108 : vector<8x32xf32>
    %111 = arith.divf %109, %110 : vector<8x32xf32>
    %112 = vector.extract_strided_slice %105 {offsets = [0, 32], sizes = [8, 32], strides = [1, 1]} : vector<8x128xf32> to vector<8x32xf32>
    %113 = arith.negf %112 : vector<8x32xf32>
    %114 = math.exp %113 : vector<8x32xf32>
    %cst_36 = arith.constant 1.000000e+00 : f32
    %115 = vector.broadcast %cst_36 : f32 to vector<8x32xf32>
    %116 = arith.addf %115, %114 : vector<8x32xf32>
    %117 = arith.divf %115, %116 : vector<8x32xf32>
    %118 = vector.extract_strided_slice %105 {offsets = [0, 64], sizes = [8, 32], strides = [1, 1]} : vector<8x128xf32> to vector<8x32xf32>
    %119 = math.tanh %118 : vector<8x32xf32>
    %120 = vector.extract_strided_slice %105 {offsets = [0, 96], sizes = [8, 32], strides = [1, 1]} : vector<8x128xf32> to vector<8x32xf32>
    %121 = arith.negf %120 : vector<8x32xf32>
    %122 = math.exp %121 : vector<8x32xf32>
    %cst_37 = arith.constant 1.000000e+00 : f32
    %123 = vector.broadcast %cst_37 : f32 to vector<8x32xf32>
    %124 = arith.addf %123, %122 : vector<8x32xf32>
    %125 = arith.divf %123, %124 : vector<8x32xf32>
    %126 = arith.mulf %117, %98 : vector<8x32xf32>
    %127 = arith.mulf %111, %119 : vector<8x32xf32>
    %128 = arith.addf %126, %127 : vector<8x32xf32>
    %129 = math.tanh %128 : vector<8x32xf32>
    %130 = arith.mulf %125, %129 : vector<8x32xf32>
    %c4_i32 = arith.constant 4 : i32
    %131 = arith.index_cast %c4_i32 : i32 to index
    %c0_38 = arith.constant 0 : index
    %c0_39 = arith.constant 0 : index
    %132 = vector.load %arg1[%131, %c0_38, %c0_39] : memref<8x8x128xf32, #tpu.memory_space<vmem>>, vector<1x8x128xf32>
    %133 = vector.shape_cast %132 : vector<1x8x128xf32> to vector<8x128xf32>
    %cst_40 = arith.constant dense<0.000000e+00> : vector<8x128xf32>
    %134 = tpu.matmul %130, %4, %cst_40 {dimension_numbers = #tpu.dot_dimension_numbers<[1], [0], [0], [1], [0, 0, 1, 1], [], []>} : vector<8x32xf32>, vector<32x128xf32>, vector<8x128xf32> -> vector<8x128xf32>
    %135 = arith.addf %133, %134 : vector<8x128xf32>
    %136 = vector.extract_strided_slice %135 {offsets = [0, 0], sizes = [8, 32], strides = [1, 1]} : vector<8x128xf32> to vector<8x32xf32>
    %137 = arith.negf %136 : vector<8x32xf32>
    %138 = math.exp %137 : vector<8x32xf32>
    %cst_41 = arith.constant 1.000000e+00 : f32
    %139 = vector.broadcast %cst_41 : f32 to vector<8x32xf32>
    %140 = arith.addf %139, %138 : vector<8x32xf32>
    %141 = arith.divf %139, %140 : vector<8x32xf32>
    %142 = vector.extract_strided_slice %135 {offsets = [0, 32], sizes = [8, 32], strides = [1, 1]} : vector<8x128xf32> to vector<8x32xf32>
    %143 = arith.negf %142 : vector<8x32xf32>
    %144 = math.exp %143 : vector<8x32xf32>
    %cst_42 = arith.constant 1.000000e+00 : f32
    %145 = vector.broadcast %cst_42 : f32 to vector<8x32xf32>
    %146 = arith.addf %145, %144 : vector<8x32xf32>
    %147 = arith.divf %145, %146 : vector<8x32xf32>
    %148 = vector.extract_strided_slice %135 {offsets = [0, 64], sizes = [8, 32], strides = [1, 1]} : vector<8x128xf32> to vector<8x32xf32>
    %149 = math.tanh %148 : vector<8x32xf32>
    %150 = vector.extract_strided_slice %135 {offsets = [0, 96], sizes = [8, 32], strides = [1, 1]} : vector<8x128xf32> to vector<8x32xf32>
    %151 = arith.negf %150 : vector<8x32xf32>
    %152 = math.exp %151 : vector<8x32xf32>
    %cst_43 = arith.constant 1.000000e+00 : f32
    %153 = vector.broadcast %cst_43 : f32 to vector<8x32xf32>
    %154 = arith.addf %153, %152 : vector<8x32xf32>
    %155 = arith.divf %153, %154 : vector<8x32xf32>
    %156 = arith.mulf %147, %128 : vector<8x32xf32>
    %157 = arith.mulf %141, %149 : vector<8x32xf32>
    %158 = arith.addf %156, %157 : vector<8x32xf32>
    %159 = math.tanh %158 : vector<8x32xf32>
    %160 = arith.mulf %155, %159 : vector<8x32xf32>
    %c5_i32 = arith.constant 5 : i32
    %161 = arith.index_cast %c5_i32 : i32 to index
    %c0_44 = arith.constant 0 : index
    %c0_45 = arith.constant 0 : index
    %162 = vector.load %arg1[%161, %c0_44, %c0_45] : memref<8x8x128xf32, #tpu.memory_space<vmem>>, vector<1x8x128xf32>
    %163 = vector.shape_cast %162 : vector<1x8x128xf32> to vector<8x128xf32>
    %cst_46 = arith.constant dense<0.000000e+00> : vector<8x128xf32>
    %164 = tpu.matmul %160, %4, %cst_46 {dimension_numbers = #tpu.dot_dimension_numbers<[1], [0], [0], [1], [0, 0, 1, 1], [], []>} : vector<8x32xf32>, vector<32x128xf32>, vector<8x128xf32> -> vector<8x128xf32>
    %165 = arith.addf %163, %164 : vector<8x128xf32>
    %166 = vector.extract_strided_slice %165 {offsets = [0, 0], sizes = [8, 32], strides = [1, 1]} : vector<8x128xf32> to vector<8x32xf32>
    %167 = arith.negf %166 : vector<8x32xf32>
    %168 = math.exp %167 : vector<8x32xf32>
    %cst_47 = arith.constant 1.000000e+00 : f32
    %169 = vector.broadcast %cst_47 : f32 to vector<8x32xf32>
    %170 = arith.addf %169, %168 : vector<8x32xf32>
    %171 = arith.divf %169, %170 : vector<8x32xf32>
    %172 = vector.extract_strided_slice %165 {offsets = [0, 32], sizes = [8, 32], strides = [1, 1]} : vector<8x128xf32> to vector<8x32xf32>
    %173 = arith.negf %172 : vector<8x32xf32>
    %174 = math.exp %173 : vector<8x32xf32>
    %cst_48 = arith.constant 1.000000e+00 : f32
    %175 = vector.broadcast %cst_48 : f32 to vector<8x32xf32>
    %176 = arith.addf %175, %174 : vector<8x32xf32>
    %177 = arith.divf %175, %176 : vector<8x32xf32>
    %178 = vector.extract_strided_slice %165 {offsets = [0, 64], sizes = [8, 32], strides = [1, 1]} : vector<8x128xf32> to vector<8x32xf32>
    %179 = math.tanh %178 : vector<8x32xf32>
    %180 = vector.extract_strided_slice %165 {offsets = [0, 96], sizes = [8, 32], strides = [1, 1]} : vector<8x128xf32> to vector<8x32xf32>
    %181 = arith.negf %180 : vector<8x32xf32>
    %182 = math.exp %181 : vector<8x32xf32>
    %cst_49 = arith.constant 1.000000e+00 : f32
    %183 = vector.broadcast %cst_49 : f32 to vector<8x32xf32>
    %184 = arith.addf %183, %182 : vector<8x32xf32>
    %185 = arith.divf %183, %184 : vector<8x32xf32>
    %186 = arith.mulf %177, %158 : vector<8x32xf32>
    %187 = arith.mulf %171, %179 : vector<8x32xf32>
    %188 = arith.addf %186, %187 : vector<8x32xf32>
    %189 = math.tanh %188 : vector<8x32xf32>
    %190 = arith.mulf %185, %189 : vector<8x32xf32>
    %c6_i32 = arith.constant 6 : i32
    %191 = arith.index_cast %c6_i32 : i32 to index
    %c0_50 = arith.constant 0 : index
    %c0_51 = arith.constant 0 : index
    %192 = vector.load %arg1[%191, %c0_50, %c0_51] : memref<8x8x128xf32, #tpu.memory_space<vmem>>, vector<1x8x128xf32>
    %193 = vector.shape_cast %192 : vector<1x8x128xf32> to vector<8x128xf32>
    %cst_52 = arith.constant dense<0.000000e+00> : vector<8x128xf32>
    %194 = tpu.matmul %190, %4, %cst_52 {dimension_numbers = #tpu.dot_dimension_numbers<[1], [0], [0], [1], [0, 0, 1, 1], [], []>} : vector<8x32xf32>, vector<32x128xf32>, vector<8x128xf32> -> vector<8x128xf32>
    %195 = arith.addf %193, %194 : vector<8x128xf32>
    %196 = vector.extract_strided_slice %195 {offsets = [0, 0], sizes = [8, 32], strides = [1, 1]} : vector<8x128xf32> to vector<8x32xf32>
    %197 = arith.negf %196 : vector<8x32xf32>
    %198 = math.exp %197 : vector<8x32xf32>
    %cst_53 = arith.constant 1.000000e+00 : f32
    %199 = vector.broadcast %cst_53 : f32 to vector<8x32xf32>
    %200 = arith.addf %199, %198 : vector<8x32xf32>
    %201 = arith.divf %199, %200 : vector<8x32xf32>
    %202 = vector.extract_strided_slice %195 {offsets = [0, 32], sizes = [8, 32], strides = [1, 1]} : vector<8x128xf32> to vector<8x32xf32>
    %203 = arith.negf %202 : vector<8x32xf32>
    %204 = math.exp %203 : vector<8x32xf32>
    %cst_54 = arith.constant 1.000000e+00 : f32
    %205 = vector.broadcast %cst_54 : f32 to vector<8x32xf32>
    %206 = arith.addf %205, %204 : vector<8x32xf32>
    %207 = arith.divf %205, %206 : vector<8x32xf32>
    %208 = vector.extract_strided_slice %195 {offsets = [0, 64], sizes = [8, 32], strides = [1, 1]} : vector<8x128xf32> to vector<8x32xf32>
    %209 = math.tanh %208 : vector<8x32xf32>
    %210 = vector.extract_strided_slice %195 {offsets = [0, 96], sizes = [8, 32], strides = [1, 1]} : vector<8x128xf32> to vector<8x32xf32>
    %211 = arith.negf %210 : vector<8x32xf32>
    %212 = math.exp %211 : vector<8x32xf32>
    %cst_55 = arith.constant 1.000000e+00 : f32
    %213 = vector.broadcast %cst_55 : f32 to vector<8x32xf32>
    %214 = arith.addf %213, %212 : vector<8x32xf32>
    %215 = arith.divf %213, %214 : vector<8x32xf32>
    %216 = arith.mulf %207, %188 : vector<8x32xf32>
    %217 = arith.mulf %201, %209 : vector<8x32xf32>
    %218 = arith.addf %216, %217 : vector<8x32xf32>
    %219 = math.tanh %218 : vector<8x32xf32>
    %220 = arith.mulf %215, %219 : vector<8x32xf32>
    %c7_i32 = arith.constant 7 : i32
    %221 = arith.index_cast %c7_i32 : i32 to index
    %c0_56 = arith.constant 0 : index
    %c0_57 = arith.constant 0 : index
    %222 = vector.load %arg1[%221, %c0_56, %c0_57] : memref<8x8x128xf32, #tpu.memory_space<vmem>>, vector<1x8x128xf32>
    %223 = vector.shape_cast %222 : vector<1x8x128xf32> to vector<8x128xf32>
    %cst_58 = arith.constant dense<0.000000e+00> : vector<8x128xf32>
    %224 = tpu.matmul %220, %4, %cst_58 {dimension_numbers = #tpu.dot_dimension_numbers<[1], [0], [0], [1], [0, 0, 1, 1], [], []>} : vector<8x32xf32>, vector<32x128xf32>, vector<8x128xf32> -> vector<8x128xf32>
    %225 = arith.addf %223, %224 : vector<8x128xf32>
    %226 = vector.extract_strided_slice %225 {offsets = [0, 0], sizes = [8, 32], strides = [1, 1]} : vector<8x128xf32> to vector<8x32xf32>
    %227 = arith.negf %226 : vector<8x32xf32>
    %228 = math.exp %227 : vector<8x32xf32>
    %cst_59 = arith.constant 1.000000e+00 : f32
    %229 = vector.broadcast %cst_59 : f32 to vector<8x32xf32>
    %230 = arith.addf %229, %228 : vector<8x32xf32>
    %231 = arith.divf %229, %230 : vector<8x32xf32>
    %232 = vector.extract_strided_slice %225 {offsets = [0, 32], sizes = [8, 32], strides = [1, 1]} : vector<8x128xf32> to vector<8x32xf32>
    %233 = arith.negf %232 : vector<8x32xf32>
    %234 = math.exp %233 : vector<8x32xf32>
    %cst_60 = arith.constant 1.000000e+00 : f32
    %235 = vector.broadcast %cst_60 : f32 to vector<8x32xf32>
    %236 = arith.addf %235, %234 : vector<8x32xf32>
    %237 = arith.divf %235, %236 : vector<8x32xf32>
    %238 = vector.extract_strided_slice %225 {offsets = [0, 64], sizes = [8, 32], strides = [1, 1]} : vector<8x128xf32> to vector<8x32xf32>
    %239 = math.tanh %238 : vector<8x32xf32>
    %240 = vector.extract_strided_slice %225 {offsets = [0, 96], sizes = [8, 32], strides = [1, 1]} : vector<8x128xf32> to vector<8x32xf32>
    %241 = arith.negf %240 : vector<8x32xf32>
    %242 = math.exp %241 : vector<8x32xf32>
    %cst_61 = arith.constant 1.000000e+00 : f32
    %243 = vector.broadcast %cst_61 : f32 to vector<8x32xf32>
    %244 = arith.addf %243, %242 : vector<8x32xf32>
    %245 = arith.divf %243, %244 : vector<8x32xf32>
    %246 = arith.mulf %237, %218 : vector<8x32xf32>
    %247 = arith.mulf %231, %239 : vector<8x32xf32>
    %248 = arith.addf %246, %247 : vector<8x32xf32>
    %249 = math.tanh %248 : vector<8x32xf32>
    %250 = arith.mulf %245, %249 : vector<8x32xf32>
    %c8_i32 = arith.constant 8 : i32
    %251 = tpu.iota {dimensions = array<i32: 1>} : vector<8x32xi32>
    %c0_62 = arith.constant 0 : index
    %c0_63 = arith.constant 0 : index
    %c0_64 = arith.constant 0 : index
    %252 = vector.load %arg2[%c0_62, %c0_63, %c0_64] : memref<8x8x128xf32, #tpu.memory_space<vmem>>, vector<1x8x128xf32>
    %253 = vector.shape_cast %252 : vector<1x8x128xf32> to vector<8x128xf32>
    %c1_i32_65 = arith.constant 1 : i32
    %cst_66 = arith.constant dense<0.000000e+00> : vector<8x128xf32>
    %254 = tpu.matmul %250, %5, %cst_66 {dimension_numbers = #tpu.dot_dimension_numbers<[1], [0], [0], [1], [0, 0, 1, 1], [], []>} : vector<8x32xf32>, vector<32x128xf32>, vector<8x128xf32> -> vector<8x128xf32>
    %255 = arith.addf %253, %254 : vector<8x128xf32>
    %256 = vector.extract_strided_slice %255 {offsets = [0, 0], sizes = [8, 32], strides = [1, 1]} : vector<8x128xf32> to vector<8x32xf32>
    %257 = arith.negf %256 : vector<8x32xf32>
    %258 = math.exp %257 : vector<8x32xf32>
    %cst_67 = arith.constant 1.000000e+00 : f32
    %259 = vector.broadcast %cst_67 : f32 to vector<8x32xf32>
    %260 = arith.addf %259, %258 : vector<8x32xf32>
    %261 = arith.divf %259, %260 : vector<8x32xf32>
    %262 = vector.extract_strided_slice %255 {offsets = [0, 32], sizes = [8, 32], strides = [1, 1]} : vector<8x128xf32> to vector<8x32xf32>
    %263 = arith.negf %262 : vector<8x32xf32>
    %264 = math.exp %263 : vector<8x32xf32>
    %cst_68 = arith.constant 1.000000e+00 : f32
    %265 = vector.broadcast %cst_68 : f32 to vector<8x32xf32>
    %266 = arith.addf %265, %264 : vector<8x32xf32>
    %267 = arith.divf %265, %266 : vector<8x32xf32>
    %268 = vector.extract_strided_slice %255 {offsets = [0, 64], sizes = [8, 32], strides = [1, 1]} : vector<8x128xf32> to vector<8x32xf32>
    %269 = math.tanh %268 : vector<8x32xf32>
    %270 = vector.extract_strided_slice %255 {offsets = [0, 96], sizes = [8, 32], strides = [1, 1]} : vector<8x128xf32> to vector<8x32xf32>
    %271 = arith.negf %270 : vector<8x32xf32>
    %272 = math.exp %271 : vector<8x32xf32>
    %cst_69 = arith.constant 1.000000e+00 : f32
    %273 = vector.broadcast %cst_69 : f32 to vector<8x32xf32>
    %274 = arith.addf %273, %272 : vector<8x32xf32>
    %275 = arith.divf %273, %274 : vector<8x32xf32>
    %276 = arith.mulf %267, %248 : vector<8x32xf32>
    %277 = arith.mulf %261, %269 : vector<8x32xf32>
    %278 = arith.addf %276, %277 : vector<8x32xf32>
    %279 = math.tanh %278 : vector<8x32xf32>
    %280 = arith.mulf %275, %279 : vector<8x32xf32>
    %cst_70 = arith.constant dense<0.000000e+00> : vector<8x32xf32>
    %281 = tpu.matmul %280, %7, %cst_70 {dimension_numbers = #tpu.dot_dimension_numbers<[1], [0], [0], [1], [0, 0, 1, 1], [], []>} : vector<8x32xf32>, vector<32x32xf32>, vector<8x32xf32> -> vector<8x32xf32>
    %282 = arith.addf %281, %8 : vector<8x32xf32>
    %283 = arith.index_cast %c1_i32_65 : i32 to index
    %c0_71 = arith.constant 0 : index
    %c0_72 = arith.constant 0 : index
    %284 = vector.load %arg8[%283, %c0_71, %c0_72] : memref<8x8x32xf32, #tpu.memory_space<vmem>>, vector<1x8x32xf32>
    %285 = vector.shape_cast %284 : vector<1x8x32xf32> to vector<8x32xf32>
    %286 = vector.shape_cast %282 : vector<8x32xf32> to vector<1x8x32xf32>
    tpu.vector_store %arg8[%283, %c0_71, %c0_72], %286 {strides = array<i32>} : memref<8x8x32xf32, #tpu.memory_space<vmem>>, vector<1x8x32xf32>,
    %287 = tpu.reduce_index %282 {axis = 1 : i32, kind = #tpu.reduction_kind<arg_max>} : vector<8x32xf32> -> vector<8xi32>
    %288 = vector.shape_cast %287 : vector<8xi32> to vector<8x1xi32>
    %289 = vector.broadcast %288 : vector<8x1xi32> to vector<8x32xi32>
    %290 = arith.cmpi eq, %251, %289 : vector<8x32xi32>
    %291 = arith.extui %290 : vector<8x32xi1> to vector<8x32xi32>
    %292 = arith.sitofp %291 : vector<8x32xi32> to vector<8x32xf32>
    %cst_73 = arith.constant dense<0.000000e+00> : vector<8x128xf32>
    %293 = tpu.matmul %292, %6, %cst_73 {dimension_numbers = #tpu.dot_dimension_numbers<[1], [0], [0], [1], [0, 0, 1, 1], [], []>} : vector<8x32xf32>, vector<32x128xf32>, vector<8x128xf32> -> vector<8x128xf32>
    %294 = arith.index_cast %c1_i32_65 : i32 to index
    %295 = memref.load %arg0[%294] : memref<8xi32, #tpu.memory_space<smem>>
    %c0_i32_74 = arith.constant 0 : i32
    %296 = arith.cmpi ne, %295, %c0_i32_74 : i32
    %297 = arith.index_cast %c1_i32_65 : i32 to index
    %c0_75 = arith.constant 0 : index
    %c0_76 = arith.constant 0 : index
    %298 = vector.load %arg2[%297, %c0_75, %c0_76] : memref<8x8x128xf32, #tpu.memory_space<vmem>>, vector<1x8x128xf32>
    %299 = vector.shape_cast %298 : vector<1x8x128xf32> to vector<8x128xf32>
    %300 = arith.select %296, %299, %293 : vector<8x128xf32>
    %c2_i32_77 = arith.constant 2 : i32
    %cst_78 = arith.constant dense<0.000000e+00> : vector<8x128xf32>
    %301 = tpu.matmul %280, %5, %cst_78 {dimension_numbers = #tpu.dot_dimension_numbers<[1], [0], [0], [1], [0, 0, 1, 1], [], []>} : vector<8x32xf32>, vector<32x128xf32>, vector<8x128xf32> -> vector<8x128xf32>
    %302 = arith.addf %300, %301 : vector<8x128xf32>
    %303 = vector.extract_strided_slice %302 {offsets = [0, 0], sizes = [8, 32], strides = [1, 1]} : vector<8x128xf32> to vector<8x32xf32>
    %304 = arith.negf %303 : vector<8x32xf32>
    %305 = math.exp %304 : vector<8x32xf32>
    %cst_79 = arith.constant 1.000000e+00 : f32
    %306 = vector.broadcast %cst_79 : f32 to vector<8x32xf32>
    %307 = arith.addf %306, %305 : vector<8x32xf32>
    %308 = arith.divf %306, %307 : vector<8x32xf32>
    %309 = vector.extract_strided_slice %302 {offsets = [0, 32], sizes = [8, 32], strides = [1, 1]} : vector<8x128xf32> to vector<8x32xf32>
    %310 = arith.negf %309 : vector<8x32xf32>
    %311 = math.exp %310 : vector<8x32xf32>
    %cst_80 = arith.constant 1.000000e+00 : f32
    %312 = vector.broadcast %cst_80 : f32 to vector<8x32xf32>
    %313 = arith.addf %312, %311 : vector<8x32xf32>
    %314 = arith.divf %312, %313 : vector<8x32xf32>
    %315 = vector.extract_strided_slice %302 {offsets = [0, 64], sizes = [8, 32], strides = [1, 1]} : vector<8x128xf32> to vector<8x32xf32>
    %316 = math.tanh %315 : vector<8x32xf32>
    %317 = vector.extract_strided_slice %302 {offsets = [0, 96], sizes = [8, 32], strides = [1, 1]} : vector<8x128xf32> to vector<8x32xf32>
    %318 = arith.negf %317 : vector<8x32xf32>
    %319 = math.exp %318 : vector<8x32xf32>
    %cst_81 = arith.constant 1.000000e+00 : f32
    %320 = vector.broadcast %cst_81 : f32 to vector<8x32xf32>
    %321 = arith.addf %320, %319 : vector<8x32xf32>
    %322 = arith.divf %320, %321 : vector<8x32xf32>
    %323 = arith.mulf %314, %278 : vector<8x32xf32>
    %324 = arith.mulf %308, %316 : vector<8x32xf32>
    %325 = arith.addf %323, %324 : vector<8x32xf32>
    %326 = math.tanh %325 : vector<8x32xf32>
    %327 = arith.mulf %322, %326 : vector<8x32xf32>
    %cst_82 = arith.constant dense<0.000000e+00> : vector<8x32xf32>
    %328 = tpu.matmul %327, %7, %cst_82 {dimension_numbers = #tpu.dot_dimension_numbers<[1], [0], [0], [1], [0, 0, 1, 1], [], []>} : vector<8x32xf32>, vector<32x32xf32>, vector<8x32xf32> -> vector<8x32xf32>
    %329 = arith.addf %328, %8 : vector<8x32xf32>
    %330 = arith.index_cast %c2_i32_77 : i32 to index
    %c0_83 = arith.constant 0 : index
    %c0_84 = arith.constant 0 : index
    %331 = vector.load %arg8[%330, %c0_83, %c0_84] : memref<8x8x32xf32, #tpu.memory_space<vmem>>, vector<1x8x32xf32>
    %332 = vector.shape_cast %331 : vector<1x8x32xf32> to vector<8x32xf32>
    %333 = vector.shape_cast %329 : vector<8x32xf32> to vector<1x8x32xf32>
    tpu.vector_store %arg8[%330, %c0_83, %c0_84], %333 {strides = array<i32>} : memref<8x8x32xf32, #tpu.memory_space<vmem>>, vector<1x8x32xf32>,
    %334 = tpu.reduce_index %329 {axis = 1 : i32, kind = #tpu.reduction_kind<arg_max>} : vector<8x32xf32> -> vector<8xi32>
    %335 = vector.shape_cast %334 : vector<8xi32> to vector<8x1xi32>
    %336 = vector.broadcast %335 : vector<8x1xi32> to vector<8x32xi32>
    %337 = arith.cmpi eq, %251, %336 : vector<8x32xi32>
    %338 = arith.extui %337 : vector<8x32xi1> to vector<8x32xi32>
    %339 = arith.sitofp %338 : vector<8x32xi32> to vector<8x32xf32>
    %cst_85 = arith.constant dense<0.000000e+00> : vector<8x128xf32>
    %340 = tpu.matmul %339, %6, %cst_85 {dimension_numbers = #tpu.dot_dimension_numbers<[1], [0], [0], [1], [0, 0, 1, 1], [], []>} : vector<8x32xf32>, vector<32x128xf32>, vector<8x128xf32> -> vector<8x128xf32>
    %341 = arith.index_cast %c2_i32_77 : i32 to index
    %342 = memref.load %arg0[%341] : memref<8xi32, #tpu.memory_space<smem>>
    %c0_i32_86 = arith.constant 0 : i32
    %343 = arith.cmpi ne, %342, %c0_i32_86 : i32
    %344 = arith.index_cast %c2_i32_77 : i32 to index
    %c0_87 = arith.constant 0 : index
    %c0_88 = arith.constant 0 : index
    %345 = vector.load %arg2[%344, %c0_87, %c0_88] : memref<8x8x128xf32, #tpu.memory_space<vmem>>, vector<1x8x128xf32>
    %346 = vector.shape_cast %345 : vector<1x8x128xf32> to vector<8x128xf32>
    %347 = arith.select %343, %346, %340 : vector<8x128xf32>
    %c3_i32_89 = arith.constant 3 : i32
    %cst_90 = arith.constant dense<0.000000e+00> : vector<8x128xf32>
    %348 = tpu.matmul %327, %5, %cst_90 {dimension_numbers = #tpu.dot_dimension_numbers<[1], [0], [0], [1], [0, 0, 1, 1], [], []>} : vector<8x32xf32>, vector<32x128xf32>, vector<8x128xf32> -> vector<8x128xf32>
    %349 = arith.addf %347, %348 : vector<8x128xf32>
    %350 = vector.extract_strided_slice %349 {offsets = [0, 0], sizes = [8, 32], strides = [1, 1]} : vector<8x128xf32> to vector<8x32xf32>
    %351 = arith.negf %350 : vector<8x32xf32>
    %352 = math.exp %351 : vector<8x32xf32>
    %cst_91 = arith.constant 1.000000e+00 : f32
    %353 = vector.broadcast %cst_91 : f32 to vector<8x32xf32>
    %354 = arith.addf %353, %352 : vector<8x32xf32>
    %355 = arith.divf %353, %354 : vector<8x32xf32>
    %356 = vector.extract_strided_slice %349 {offsets = [0, 32], sizes = [8, 32], strides = [1, 1]} : vector<8x128xf32> to vector<8x32xf32>
    %357 = arith.negf %356 : vector<8x32xf32>
    %358 = math.exp %357 : vector<8x32xf32>
    %cst_92 = arith.constant 1.000000e+00 : f32
    %359 = vector.broadcast %cst_92 : f32 to vector<8x32xf32>
    %360 = arith.addf %359, %358 : vector<8x32xf32>
    %361 = arith.divf %359, %360 : vector<8x32xf32>
    %362 = vector.extract_strided_slice %349 {offsets = [0, 64], sizes = [8, 32], strides = [1, 1]} : vector<8x128xf32> to vector<8x32xf32>
    %363 = math.tanh %362 : vector<8x32xf32>
    %364 = vector.extract_strided_slice %349 {offsets = [0, 96], sizes = [8, 32], strides = [1, 1]} : vector<8x128xf32> to vector<8x32xf32>
    %365 = arith.negf %364 : vector<8x32xf32>
    %366 = math.exp %365 : vector<8x32xf32>
    %cst_93 = arith.constant 1.000000e+00 : f32
    %367 = vector.broadcast %cst_93 : f32 to vector<8x32xf32>
    %368 = arith.addf %367, %366 : vector<8x32xf32>
    %369 = arith.divf %367, %368 : vector<8x32xf32>
    %370 = arith.mulf %361, %325 : vector<8x32xf32>
    %371 = arith.mulf %355, %363 : vector<8x32xf32>
    %372 = arith.addf %370, %371 : vector<8x32xf32>
    %373 = math.tanh %372 : vector<8x32xf32>
    %374 = arith.mulf %369, %373 : vector<8x32xf32>
    %cst_94 = arith.constant dense<0.000000e+00> : vector<8x32xf32>
    %375 = tpu.matmul %374, %7, %cst_94 {dimension_numbers = #tpu.dot_dimension_numbers<[1], [0], [0], [1], [0, 0, 1, 1], [], []>} : vector<8x32xf32>, vector<32x32xf32>, vector<8x32xf32> -> vector<8x32xf32>
    %376 = arith.addf %375, %8 : vector<8x32xf32>
    %377 = arith.index_cast %c3_i32_89 : i32 to index
    %c0_95 = arith.constant 0 : index
    %c0_96 = arith.constant 0 : index
    %378 = vector.load %arg8[%377, %c0_95, %c0_96] : memref<8x8x32xf32, #tpu.memory_space<vmem>>, vector<1x8x32xf32>
    %379 = vector.shape_cast %378 : vector<1x8x32xf32> to vector<8x32xf32>
    %380 = vector.shape_cast %376 : vector<8x32xf32> to vector<1x8x32xf32>
    tpu.vector_store %arg8[%377, %c0_95, %c0_96], %380 {strides = array<i32>} : memref<8x8x32xf32, #tpu.memory_space<vmem>>, vector<1x8x32xf32>,
    %381 = tpu.reduce_index %376 {axis = 1 : i32, kind = #tpu.reduction_kind<arg_max>} : vector<8x32xf32> -> vector<8xi32>
    %382 = vector.shape_cast %381 : vector<8xi32> to vector<8x1xi32>
    %383 = vector.broadcast %382 : vector<8x1xi32> to vector<8x32xi32>
    %384 = arith.cmpi eq, %251, %383 : vector<8x32xi32>
    %385 = arith.extui %384 : vector<8x32xi1> to vector<8x32xi32>
    %386 = arith.sitofp %385 : vector<8x32xi32> to vector<8x32xf32>
    %cst_97 = arith.constant dense<0.000000e+00> : vector<8x128xf32>
    %387 = tpu.matmul %386, %6, %cst_97 {dimension_numbers = #tpu.dot_dimension_numbers<[1], [0], [0], [1], [0, 0, 1, 1], [], []>} : vector<8x32xf32>, vector<32x128xf32>, vector<8x128xf32> -> vector<8x128xf32>
    %388 = arith.index_cast %c3_i32_89 : i32 to index
    %389 = memref.load %arg0[%388] : memref<8xi32, #tpu.memory_space<smem>>
    %c0_i32_98 = arith.constant 0 : i32
    %390 = arith.cmpi ne, %389, %c0_i32_98 : i32
    %391 = arith.index_cast %c3_i32_89 : i32 to index
    %c0_99 = arith.constant 0 : index
    %c0_100 = arith.constant 0 : index
    %392 = vector.load %arg2[%391, %c0_99, %c0_100] : memref<8x8x128xf32, #tpu.memory_space<vmem>>, vector<1x8x128xf32>
    %393 = vector.shape_cast %392 : vector<1x8x128xf32> to vector<8x128xf32>
    %394 = arith.select %390, %393, %387 : vector<8x128xf32>
    %c4_i32_101 = arith.constant 4 : i32
    %cst_102 = arith.constant dense<0.000000e+00> : vector<8x128xf32>
    %395 = tpu.matmul %374, %5, %cst_102 {dimension_numbers = #tpu.dot_dimension_numbers<[1], [0], [0], [1], [0, 0, 1, 1], [], []>} : vector<8x32xf32>, vector<32x128xf32>, vector<8x128xf32> -> vector<8x128xf32>
    %396 = arith.addf %394, %395 : vector<8x128xf32>
    %397 = vector.extract_strided_slice %396 {offsets = [0, 0], sizes = [8, 32], strides = [1, 1]} : vector<8x128xf32> to vector<8x32xf32>
    %398 = arith.negf %397 : vector<8x32xf32>
    %399 = math.exp %398 : vector<8x32xf32>
    %cst_103 = arith.constant 1.000000e+00 : f32
    %400 = vector.broadcast %cst_103 : f32 to vector<8x32xf32>
    %401 = arith.addf %400, %399 : vector<8x32xf32>
    %402 = arith.divf %400, %401 : vector<8x32xf32>
    %403 = vector.extract_strided_slice %396 {offsets = [0, 32], sizes = [8, 32], strides = [1, 1]} : vector<8x128xf32> to vector<8x32xf32>
    %404 = arith.negf %403 : vector<8x32xf32>
    %405 = math.exp %404 : vector<8x32xf32>
    %cst_104 = arith.constant 1.000000e+00 : f32
    %406 = vector.broadcast %cst_104 : f32 to vector<8x32xf32>
    %407 = arith.addf %406, %405 : vector<8x32xf32>
    %408 = arith.divf %406, %407 : vector<8x32xf32>
    %409 = vector.extract_strided_slice %396 {offsets = [0, 64], sizes = [8, 32], strides = [1, 1]} : vector<8x128xf32> to vector<8x32xf32>
    %410 = math.tanh %409 : vector<8x32xf32>
    %411 = vector.extract_strided_slice %396 {offsets = [0, 96], sizes = [8, 32], strides = [1, 1]} : vector<8x128xf32> to vector<8x32xf32>
    %412 = arith.negf %411 : vector<8x32xf32>
    %413 = math.exp %412 : vector<8x32xf32>
    %cst_105 = arith.constant 1.000000e+00 : f32
    %414 = vector.broadcast %cst_105 : f32 to vector<8x32xf32>
    %415 = arith.addf %414, %413 : vector<8x32xf32>
    %416 = arith.divf %414, %415 : vector<8x32xf32>
    %417 = arith.mulf %408, %372 : vector<8x32xf32>
    %418 = arith.mulf %402, %410 : vector<8x32xf32>
    %419 = arith.addf %417, %418 : vector<8x32xf32>
    %420 = math.tanh %419 : vector<8x32xf32>
    %421 = arith.mulf %416, %420 : vector<8x32xf32>
    %cst_106 = arith.constant dense<0.000000e+00> : vector<8x32xf32>
    %422 = tpu.matmul %421, %7, %cst_106 {dimension_numbers = #tpu.dot_dimension_numbers<[1], [0], [0], [1], [0, 0, 1, 1], [], []>} : vector<8x32xf32>, vector<32x32xf32>, vector<8x32xf32> -> vector<8x32xf32>
    %423 = arith.addf %422, %8 : vector<8x32xf32>
    %424 = arith.index_cast %c4_i32_101 : i32 to index
    %c0_107 = arith.constant 0 : index
    %c0_108 = arith.constant 0 : index
    %425 = vector.load %arg8[%424, %c0_107, %c0_108] : memref<8x8x32xf32, #tpu.memory_space<vmem>>, vector<1x8x32xf32>
    %426 = vector.shape_cast %425 : vector<1x8x32xf32> to vector<8x32xf32>
    %427 = vector.shape_cast %423 : vector<8x32xf32> to vector<1x8x32xf32>
    tpu.vector_store %arg8[%424, %c0_107, %c0_108], %427 {strides = array<i32>} : memref<8x8x32xf32, #tpu.memory_space<vmem>>, vector<1x8x32xf32>,
    %428 = tpu.reduce_index %423 {axis = 1 : i32, kind = #tpu.reduction_kind<arg_max>} : vector<8x32xf32> -> vector<8xi32>
    %429 = vector.shape_cast %428 : vector<8xi32> to vector<8x1xi32>
    %430 = vector.broadcast %429 : vector<8x1xi32> to vector<8x32xi32>
    %431 = arith.cmpi eq, %251, %430 : vector<8x32xi32>
    %432 = arith.extui %431 : vector<8x32xi1> to vector<8x32xi32>
    %433 = arith.sitofp %432 : vector<8x32xi32> to vector<8x32xf32>
    %cst_109 = arith.constant dense<0.000000e+00> : vector<8x128xf32>
    %434 = tpu.matmul %433, %6, %cst_109 {dimension_numbers = #tpu.dot_dimension_numbers<[1], [0], [0], [1], [0, 0, 1, 1], [], []>} : vector<8x32xf32>, vector<32x128xf32>, vector<8x128xf32> -> vector<8x128xf32>
    %435 = arith.index_cast %c4_i32_101 : i32 to index
    %436 = memref.load %arg0[%435] : memref<8xi32, #tpu.memory_space<smem>>
    %c0_i32_110 = arith.constant 0 : i32
    %437 = arith.cmpi ne, %436, %c0_i32_110 : i32
    %438 = arith.index_cast %c4_i32_101 : i32 to index
    %c0_111 = arith.constant 0 : index
    %c0_112 = arith.constant 0 : index
    %439 = vector.load %arg2[%438, %c0_111, %c0_112] : memref<8x8x128xf32, #tpu.memory_space<vmem>>, vector<1x8x128xf32>
    %440 = vector.shape_cast %439 : vector<1x8x128xf32> to vector<8x128xf32>
    %441 = arith.select %437, %440, %434 : vector<8x128xf32>
    %c5_i32_113 = arith.constant 5 : i32
    %cst_114 = arith.constant dense<0.000000e+00> : vector<8x128xf32>
    %442 = tpu.matmul %421, %5, %cst_114 {dimension_numbers = #tpu.dot_dimension_numbers<[1], [0], [0], [1], [0, 0, 1, 1], [], []>} : vector<8x32xf32>, vector<32x128xf32>, vector<8x128xf32> -> vector<8x128xf32>
    %443 = arith.addf %441, %442 : vector<8x128xf32>
    %444 = vector.extract_strided_slice %443 {offsets = [0, 0], sizes = [8, 32], strides = [1, 1]} : vector<8x128xf32> to vector<8x32xf32>
    %445 = arith.negf %444 : vector<8x32xf32>
    %446 = math.exp %445 : vector<8x32xf32>
    %cst_115 = arith.constant 1.000000e+00 : f32
    %447 = vector.broadcast %cst_115 : f32 to vector<8x32xf32>
    %448 = arith.addf %447, %446 : vector<8x32xf32>
    %449 = arith.divf %447, %448 : vector<8x32xf32>
    %450 = vector.extract_strided_slice %443 {offsets = [0, 32], sizes = [8, 32], strides = [1, 1]} : vector<8x128xf32> to vector<8x32xf32>
    %451 = arith.negf %450 : vector<8x32xf32>
    %452 = math.exp %451 : vector<8x32xf32>
    %cst_116 = arith.constant 1.000000e+00 : f32
    %453 = vector.broadcast %cst_116 : f32 to vector<8x32xf32>
    %454 = arith.addf %453, %452 : vector<8x32xf32>
    %455 = arith.divf %453, %454 : vector<8x32xf32>
    %456 = vector.extract_strided_slice %443 {offsets = [0, 64], sizes = [8, 32], strides = [1, 1]} : vector<8x128xf32> to vector<8x32xf32>
    %457 = math.tanh %456 : vector<8x32xf32>
    %458 = vector.extract_strided_slice %443 {offsets = [0, 96], sizes = [8, 32], strides = [1, 1]} : vector<8x128xf32> to vector<8x32xf32>
    %459 = arith.negf %458 : vector<8x32xf32>
    %460 = math.exp %459 : vector<8x32xf32>
    %cst_117 = arith.constant 1.000000e+00 : f32
    %461 = vector.broadcast %cst_117 : f32 to vector<8x32xf32>
    %462 = arith.addf %461, %460 : vector<8x32xf32>
    %463 = arith.divf %461, %462 : vector<8x32xf32>
    %464 = arith.mulf %455, %419 : vector<8x32xf32>
    %465 = arith.mulf %449, %457 : vector<8x32xf32>
    %466 = arith.addf %464, %465 : vector<8x32xf32>
    %467 = math.tanh %466 : vector<8x32xf32>
    %468 = arith.mulf %463, %467 : vector<8x32xf32>
    %cst_118 = arith.constant dense<0.000000e+00> : vector<8x32xf32>
    %469 = tpu.matmul %468, %7, %cst_118 {dimension_numbers = #tpu.dot_dimension_numbers<[1], [0], [0], [1], [0, 0, 1, 1], [], []>} : vector<8x32xf32>, vector<32x32xf32>, vector<8x32xf32> -> vector<8x32xf32>
    %470 = arith.addf %469, %8 : vector<8x32xf32>
    %471 = arith.index_cast %c5_i32_113 : i32 to index
    %c0_119 = arith.constant 0 : index
    %c0_120 = arith.constant 0 : index
    %472 = vector.load %arg8[%471, %c0_119, %c0_120] : memref<8x8x32xf32, #tpu.memory_space<vmem>>, vector<1x8x32xf32>
    %473 = vector.shape_cast %472 : vector<1x8x32xf32> to vector<8x32xf32>
    %474 = vector.shape_cast %470 : vector<8x32xf32> to vector<1x8x32xf32>
    tpu.vector_store %arg8[%471, %c0_119, %c0_120], %474 {strides = array<i32>} : memref<8x8x32xf32, #tpu.memory_space<vmem>>, vector<1x8x32xf32>,
    %475 = tpu.reduce_index %470 {axis = 1 : i32, kind = #tpu.reduction_kind<arg_max>} : vector<8x32xf32> -> vector<8xi32>
    %476 = vector.shape_cast %475 : vector<8xi32> to vector<8x1xi32>
    %477 = vector.broadcast %476 : vector<8x1xi32> to vector<8x32xi32>
    %478 = arith.cmpi eq, %251, %477 : vector<8x32xi32>
    %479 = arith.extui %478 : vector<8x32xi1> to vector<8x32xi32>
    %480 = arith.sitofp %479 : vector<8x32xi32> to vector<8x32xf32>
    %cst_121 = arith.constant dense<0.000000e+00> : vector<8x128xf32>
    %481 = tpu.matmul %480, %6, %cst_121 {dimension_numbers = #tpu.dot_dimension_numbers<[1], [0], [0], [1], [0, 0, 1, 1], [], []>} : vector<8x32xf32>, vector<32x128xf32>, vector<8x128xf32> -> vector<8x128xf32>
    %482 = arith.index_cast %c5_i32_113 : i32 to index
    %483 = memref.load %arg0[%482] : memref<8xi32, #tpu.memory_space<smem>>
    %c0_i32_122 = arith.constant 0 : i32
    %484 = arith.cmpi ne, %483, %c0_i32_122 : i32
    %485 = arith.index_cast %c5_i32_113 : i32 to index
    %c0_123 = arith.constant 0 : index
    %c0_124 = arith.constant 0 : index
    %486 = vector.load %arg2[%485, %c0_123, %c0_124] : memref<8x8x128xf32, #tpu.memory_space<vmem>>, vector<1x8x128xf32>
    %487 = vector.shape_cast %486 : vector<1x8x128xf32> to vector<8x128xf32>
    %488 = arith.select %484, %487, %481 : vector<8x128xf32>
    %c6_i32_125 = arith.constant 6 : i32
    %cst_126 = arith.constant dense<0.000000e+00> : vector<8x128xf32>
    %489 = tpu.matmul %468, %5, %cst_126 {dimension_numbers = #tpu.dot_dimension_numbers<[1], [0], [0], [1], [0, 0, 1, 1], [], []>} : vector<8x32xf32>, vector<32x128xf32>, vector<8x128xf32> -> vector<8x128xf32>
    %490 = arith.addf %488, %489 : vector<8x128xf32>
    %491 = vector.extract_strided_slice %490 {offsets = [0, 0], sizes = [8, 32], strides = [1, 1]} : vector<8x128xf32> to vector<8x32xf32>
    %492 = arith.negf %491 : vector<8x32xf32>
    %493 = math.exp %492 : vector<8x32xf32>
    %cst_127 = arith.constant 1.000000e+00 : f32
    %494 = vector.broadcast %cst_127 : f32 to vector<8x32xf32>
    %495 = arith.addf %494, %493 : vector<8x32xf32>
    %496 = arith.divf %494, %495 : vector<8x32xf32>
    %497 = vector.extract_strided_slice %490 {offsets = [0, 32], sizes = [8, 32], strides = [1, 1]} : vector<8x128xf32> to vector<8x32xf32>
    %498 = arith.negf %497 : vector<8x32xf32>
    %499 = math.exp %498 : vector<8x32xf32>
    %cst_128 = arith.constant 1.000000e+00 : f32
    %500 = vector.broadcast %cst_128 : f32 to vector<8x32xf32>
    %501 = arith.addf %500, %499 : vector<8x32xf32>
    %502 = arith.divf %500, %501 : vector<8x32xf32>
    %503 = vector.extract_strided_slice %490 {offsets = [0, 64], sizes = [8, 32], strides = [1, 1]} : vector<8x128xf32> to vector<8x32xf32>
    %504 = math.tanh %503 : vector<8x32xf32>
    %505 = vector.extract_strided_slice %490 {offsets = [0, 96], sizes = [8, 32], strides = [1, 1]} : vector<8x128xf32> to vector<8x32xf32>
    %506 = arith.negf %505 : vector<8x32xf32>
    %507 = math.exp %506 : vector<8x32xf32>
    %cst_129 = arith.constant 1.000000e+00 : f32
    %508 = vector.broadcast %cst_129 : f32 to vector<8x32xf32>
    %509 = arith.addf %508, %507 : vector<8x32xf32>
    %510 = arith.divf %508, %509 : vector<8x32xf32>
    %511 = arith.mulf %502, %466 : vector<8x32xf32>
    %512 = arith.mulf %496, %504 : vector<8x32xf32>
    %513 = arith.addf %511, %512 : vector<8x32xf32>
    %514 = math.tanh %513 : vector<8x32xf32>
    %515 = arith.mulf %510, %514 : vector<8x32xf32>
    %cst_130 = arith.constant dense<0.000000e+00> : vector<8x32xf32>
    %516 = tpu.matmul %515, %7, %cst_130 {dimension_numbers = #tpu.dot_dimension_numbers<[1], [0], [0], [1], [0, 0, 1, 1], [], []>} : vector<8x32xf32>, vector<32x32xf32>, vector<8x32xf32> -> vector<8x32xf32>
    %517 = arith.addf %516, %8 : vector<8x32xf32>
    %518 = arith.index_cast %c6_i32_125 : i32 to index
    %c0_131 = arith.constant 0 : index
    %c0_132 = arith.constant 0 : index
    %519 = vector.load %arg8[%518, %c0_131, %c0_132] : memref<8x8x32xf32, #tpu.memory_space<vmem>>, vector<1x8x32xf32>
    %520 = vector.shape_cast %519 : vector<1x8x32xf32> to vector<8x32xf32>
    %521 = vector.shape_cast %517 : vector<8x32xf32> to vector<1x8x32xf32>
    tpu.vector_store %arg8[%518, %c0_131, %c0_132], %521 {strides = array<i32>} : memref<8x8x32xf32, #tpu.memory_space<vmem>>, vector<1x8x32xf32>,
    %522 = tpu.reduce_index %517 {axis = 1 : i32, kind = #tpu.reduction_kind<arg_max>} : vector<8x32xf32> -> vector<8xi32>
    %523 = vector.shape_cast %522 : vector<8xi32> to vector<8x1xi32>
    %524 = vector.broadcast %523 : vector<8x1xi32> to vector<8x32xi32>
    %525 = arith.cmpi eq, %251, %524 : vector<8x32xi32>
    %526 = arith.extui %525 : vector<8x32xi1> to vector<8x32xi32>
    %527 = arith.sitofp %526 : vector<8x32xi32> to vector<8x32xf32>
    %cst_133 = arith.constant dense<0.000000e+00> : vector<8x128xf32>
    %528 = tpu.matmul %527, %6, %cst_133 {dimension_numbers = #tpu.dot_dimension_numbers<[1], [0], [0], [1], [0, 0, 1, 1], [], []>} : vector<8x32xf32>, vector<32x128xf32>, vector<8x128xf32> -> vector<8x128xf32>
    %529 = arith.index_cast %c6_i32_125 : i32 to index
    %530 = memref.load %arg0[%529] : memref<8xi32, #tpu.memory_space<smem>>
    %c0_i32_134 = arith.constant 0 : i32
    %531 = arith.cmpi ne, %530, %c0_i32_134 : i32
    %532 = arith.index_cast %c6_i32_125 : i32 to index
    %c0_135 = arith.constant 0 : index
    %c0_136 = arith.constant 0 : index
    %533 = vector.load %arg2[%532, %c0_135, %c0_136] : memref<8x8x128xf32, #tpu.memory_space<vmem>>, vector<1x8x128xf32>
    %534 = vector.shape_cast %533 : vector<1x8x128xf32> to vector<8x128xf32>
    %535 = arith.select %531, %534, %528 : vector<8x128xf32>
    %c7_i32_137 = arith.constant 7 : i32
    %cst_138 = arith.constant dense<0.000000e+00> : vector<8x128xf32>
    %536 = tpu.matmul %515, %5, %cst_138 {dimension_numbers = #tpu.dot_dimension_numbers<[1], [0], [0], [1], [0, 0, 1, 1], [], []>} : vector<8x32xf32>, vector<32x128xf32>, vector<8x128xf32> -> vector<8x128xf32>
    %537 = arith.addf %535, %536 : vector<8x128xf32>
    %538 = vector.extract_strided_slice %537 {offsets = [0, 0], sizes = [8, 32], strides = [1, 1]} : vector<8x128xf32> to vector<8x32xf32>
    %539 = arith.negf %538 : vector<8x32xf32>
    %540 = math.exp %539 : vector<8x32xf32>
    %cst_139 = arith.constant 1.000000e+00 : f32
    %541 = vector.broadcast %cst_139 : f32 to vector<8x32xf32>
    %542 = arith.addf %541, %540 : vector<8x32xf32>
    %543 = arith.divf %541, %542 : vector<8x32xf32>
    %544 = vector.extract_strided_slice %537 {offsets = [0, 32], sizes = [8, 32], strides = [1, 1]} : vector<8x128xf32> to vector<8x32xf32>
    %545 = arith.negf %544 : vector<8x32xf32>
    %546 = math.exp %545 : vector<8x32xf32>
    %cst_140 = arith.constant 1.000000e+00 : f32
    %547 = vector.broadcast %cst_140 : f32 to vector<8x32xf32>
    %548 = arith.addf %547, %546 : vector<8x32xf32>
    %549 = arith.divf %547, %548 : vector<8x32xf32>
    %550 = vector.extract_strided_slice %537 {offsets = [0, 64], sizes = [8, 32], strides = [1, 1]} : vector<8x128xf32> to vector<8x32xf32>
    %551 = math.tanh %550 : vector<8x32xf32>
    %552 = vector.extract_strided_slice %537 {offsets = [0, 96], sizes = [8, 32], strides = [1, 1]} : vector<8x128xf32> to vector<8x32xf32>
    %553 = arith.negf %552 : vector<8x32xf32>
    %554 = math.exp %553 : vector<8x32xf32>
    %cst_141 = arith.constant 1.000000e+00 : f32
    %555 = vector.broadcast %cst_141 : f32 to vector<8x32xf32>
    %556 = arith.addf %555, %554 : vector<8x32xf32>
    %557 = arith.divf %555, %556 : vector<8x32xf32>
    %558 = arith.mulf %549, %513 : vector<8x32xf32>
    %559 = arith.mulf %543, %551 : vector<8x32xf32>
    %560 = arith.addf %558, %559 : vector<8x32xf32>
    %561 = math.tanh %560 : vector<8x32xf32>
    %562 = arith.mulf %557, %561 : vector<8x32xf32>
    %cst_142 = arith.constant dense<0.000000e+00> : vector<8x32xf32>
    %563 = tpu.matmul %562, %7, %cst_142 {dimension_numbers = #tpu.dot_dimension_numbers<[1], [0], [0], [1], [0, 0, 1, 1], [], []>} : vector<8x32xf32>, vector<32x32xf32>, vector<8x32xf32> -> vector<8x32xf32>
    %564 = arith.addf %563, %8 : vector<8x32xf32>
    %565 = arith.index_cast %c7_i32_137 : i32 to index
    %c0_143 = arith.constant 0 : index
    %c0_144 = arith.constant 0 : index
    %566 = vector.load %arg8[%565, %c0_143, %c0_144] : memref<8x8x32xf32, #tpu.memory_space<vmem>>, vector<1x8x32xf32>
    %567 = vector.shape_cast %566 : vector<1x8x32xf32> to vector<8x32xf32>
    %568 = vector.shape_cast %564 : vector<8x32xf32> to vector<1x8x32xf32>
    tpu.vector_store %arg8[%565, %c0_143, %c0_144], %568 {strides = array<i32>} : memref<8x8x32xf32, #tpu.memory_space<vmem>>, vector<1x8x32xf32>,
    %569 = tpu.reduce_index %564 {axis = 1 : i32, kind = #tpu.reduction_kind<arg_max>} : vector<8x32xf32> -> vector<8xi32>
    %570 = vector.shape_cast %569 : vector<8xi32> to vector<8x1xi32>
    %571 = vector.broadcast %570 : vector<8x1xi32> to vector<8x32xi32>
    %572 = arith.cmpi eq, %251, %571 : vector<8x32xi32>
    %573 = arith.extui %572 : vector<8x32xi1> to vector<8x32xi32>
    %574 = arith.sitofp %573 : vector<8x32xi32> to vector<8x32xf32>
    %cst_145 = arith.constant dense<0.000000e+00> : vector<8x128xf32>
    %575 = tpu.matmul %574, %6, %cst_145 {dimension_numbers = #tpu.dot_dimension_numbers<[1], [0], [0], [1], [0, 0, 1, 1], [], []>} : vector<8x32xf32>, vector<32x128xf32>, vector<8x128xf32> -> vector<8x128xf32>
    %576 = arith.index_cast %c7_i32_137 : i32 to index
    %577 = memref.load %arg0[%576] : memref<8xi32, #tpu.memory_space<smem>>
    %c0_i32_146 = arith.constant 0 : i32
    %578 = arith.cmpi ne, %577, %c0_i32_146 : i32
    %579 = arith.index_cast %c7_i32_137 : i32 to index
    %c0_147 = arith.constant 0 : index
    %c0_148 = arith.constant 0 : index
    %580 = vector.load %arg2[%579, %c0_147, %c0_148] : memref<8x8x128xf32, #tpu.memory_space<vmem>>, vector<1x8x128xf32>
    %581 = vector.shape_cast %580 : vector<1x8x128xf32> to vector<8x128xf32>
    %582 = arith.select %578, %581, %575 : vector<8x128xf32>
    %c7_i32_149 = arith.constant 7 : i32
    return
  }
}

</mosaic_0001>

<bundles_post_ra>
// kernel: tpu_custom_call.1
= control target key start
LH: loop header
LB: loop body
LE: loop exit
PB: predicated region body
PF: predicated region fallthrough
CT: control target
= control target key end

     0   :  { %13 = vsyncpa [#allocation5], 0  ;;  %s4071_s0 = inlined_call_operand.hbm [shape: s32[8], index: 0, kind: input, shape index: {}]   ;;  %s4072_s1 = inlined_call_operand.hbm [shape: f32[8,8,128], index: 1, kind: input, shape index: {}]   ;;  %s4073_s2 = inlined_call_operand.hbm [shape: f32[8,8,128], index: 2, kind: input, shape index: {}]   ;;  %s4074_s3 = inlined_call_operand.hbm [shape: f32[32,128], index: 3, kind: input, shape index: {}]   ;;  %s4075_s4 = inlined_call_operand.hbm [shape: f32[32,128], index: 4, kind: input, shape index: {}]   ;;  %s4076_s5 = inlined_call_operand.hbm [shape: f32[32,128], index: 5, kind: input, shape index: {}]   ;;  %s4077_s6 = inlined_call_operand.hbm [shape: f32[32,32], index: 6, kind: input, shape index: {}]   ;;  %s4078_s7 = inlined_call_operand.vmem [shape: f32[8,32], index: 7, kind: input, shape index: {}]   ;;  %s4079_s8 = inlined_call_operand.hbm [shape: f32[8,8,32], index: 8, kind: output, shape index: {}]  }
   0x1   :  { %14 = vsyncpa [#allocation3], 0 }
   0x2   :  { %15 = vsyncpa [#allocation8], 0 }
   0x3   :  { %16 = vsyncpa [#allocation11], 0 }
   0x4   :  { %17 = vsyncpa [#allocation14], 0 }
   0x5   :  { %18 = vsyncpa [#allocation4], 0  ;;  %s3506_s27 = smov [#allocation7]   ;;  %s3507_s29 = smov [#allocation10]  }
   0x6   :  { %s44_s28 = sshll.u32 %s3506_s27, 4  ;;  %s68_s30 = sshll.u32 %s3507_s29, 4  ;;  %s45_s28 = int_to_ptr.vmem [resolvable:$true] %s44_s28  ;;  %s69_s30 = int_to_ptr.vmem [resolvable:$true] %s68_s30 }
   0x7   :  { %s3354_s9 = scalar_lea.vmem %s45_s28, 1024  ;;  %p3359_p1 = scmp.lt.s32.totalorder %s45_s28, %s45_s28 }
   0x8   :  { %p3355_p0 = scmp.ne.s32.totalorder %s45_s28, %s3354_s9  ;;  %p3360_p2 = scmp.lt.s32.totalorder %s3354_s9, %s3354_s9 }
   0xa   :  { %p3361_p3 = por %p3360_p2, %p3359_p1 }
   0xc   :  { %p3362_p4 = pnand %p3361_p3, %p3355_p0 }
   0xe   :  { %3365 = shalt.err (!%p3362_p4)
}
   0xf   :  { %s3508_s10 = smov 128   ;;  %s3509_s11 = smov 8  }
  0x10   :  { %50 = dma.hbm_to_vmem [thread:$0]  %s4073_s2, 1024, %s45_s28, [#allocation8], %s3508_s10, %s3508_s10, %s3509_s11  }
  0x11   :  { %s3374_s14 = scalar_lea.vmem %s69_s30, 512  ;;  %p3379_p6 = scmp.lt.s32.totalorder %s69_s30, %s69_s30 }
  0x12   :  { %p3375_p5 = scmp.ne.s32.totalorder %s69_s30, %s3374_s14  ;;  %p3380_p7 = scmp.lt.s32.totalorder %s3374_s14, %s3374_s14 }
  0x14   :  { %p3381_p8 = por %p3380_p7, %p3379_p6 }
  0x16   :  { %p3382_p9 = pnand %p3381_p8, %p3375_p5 }
  0x18   :  { %3385 = shalt.err (!%p3382_p9)
}
  0x19   :  { %74 = dma.hbm_to_vmem [thread:$0]  %s4075_s4, 512, %s69_s30, [#allocation11], %s3508_s10, %s3508_s10, %s3509_s11  }
  0x1a   :  { %s3510_s17 = smov [#allocation2]   ;;  %s3511_s2 = smov [#allocation6]  }
  0x1b   :  { %26 = dma.hbm_to_smem %s4071_s0, 16, %s3510_s17, [#allocation5]  }
  0x1c   :  { %s32_s20 = sshll.u32 %s3511_s2, 4  ;;  %s3512_s21 = smov [#allocation9]   ;;  %s33_s20 = int_to_ptr.vmem [resolvable:$true] %s32_s20 }
  0x1d   :  { %s56_s22 = sshll.u32 %s3512_s21, 4  ;;  %s3402_s23 = scalar_lea.vmem %s33_s20, 1024  ;;  %s57_s22 = int_to_ptr.vmem [resolvable:$true] %s56_s22 }
  0x1e   :  { %p3403_p10 = scmp.ne.s32.totalorder %s33_s20, %s3402_s23  ;;  %p3407_p11 = scmp.lt.s32.totalorder %s33_s20, %s33_s20 }
  0x1f   :  { %p3408_p12 = scmp.lt.s32.totalorder %s3402_s23, %s3402_s23 }
  0x21   :  { %p3409_p13 = por %p3408_p12, %p3407_p11 }
  0x23   :  { %p3410_p0 = pnand %p3409_p13, %p3403_p10 }
  0x25   :  { %3413 = shalt.err (!%p3410_p0)
}
  0x26   :  { %38 = dma.hbm_to_vmem [thread:$0]  %s4072_s1, 1024, %s33_s20, [#allocation3], %s3508_s10, %s3508_s10, %s3509_s11  }
  0x27   :  { %s3422_s0 = scalar_lea.vmem %s57_s22, 512  ;;  %p3427_p2 = scmp.lt.s32.totalorder %s57_s22, %s57_s22 }
  0x28   :  { %p3423_p1 = scmp.ne.s32.totalorder %s57_s22, %s3422_s0  ;;  %p3428_p3 = scmp.lt.s32.totalorder %s3422_s0, %s3422_s0 }
  0x2a   :  { %p3429_p4 = por %p3428_p3, %p3427_p2 }
  0x2c   :  { %p3430_p5 = pnand %p3429_p4, %p3423_p1 }
  0x2e   :  { %3433 = shalt.err (!%p3430_p5)
}
  0x2f   :  { %62 = dma.hbm_to_vmem [thread:$0]  %s4074_s3, 512, %s57_s22, [#allocation8], %s3508_s10, %s3508_s10, %s3509_s11  }
  0x30   :  { %s3513_s27 = smov [#allocation12]   ;;  %s3514_s29 = smov [#allocation13]  }
  0x31   :  { %s80_s28 = sshll.u32 %s3513_s27, 4  ;;  %s92_s1 = sshll.u32 %s3514_s29, 4  ;;  %s81_s28 = int_to_ptr.vmem [resolvable:$true] %s80_s28  ;;  %s93_s1 = int_to_ptr.vmem [resolvable:$true] %s92_s1 }
  0x32   :  { %s3442_s30 = scalar_lea.vmem %s81_s28, 512  ;;  %p3447_p7 = scmp.lt.s32.totalorder %s81_s28, %s81_s28 }
  0x33   :  { %p3443_p6 = scmp.ne.s32.totalorder %s81_s28, %s3442_s30  ;;  %p3448_p8 = scmp.lt.s32.totalorder %s3442_s30, %s3442_s30 }
  0x35   :  { %p3449_p9 = por %p3448_p8, %p3447_p7 }
  0x37   :  { %p3450_p10 = pnand %p3449_p9, %p3443_p6 }
  0x39   :  { %3453 = shalt.err (!%p3450_p10)
}
  0x3a   :  { %86 = dma.hbm_to_vmem [thread:$0]  %s4076_s5, 512, %s81_s28, [#allocation11], %s3508_s10, %s3508_s10, %s3509_s11  }
  0x3b   :  { %s3462_s3 = scalar_lea.vmem %s93_s1, 512  ;;  %p3467_p12 = scmp.lt.s32.totalorder %s93_s1, %s93_s1 }
  0x3c   :  { %p3463_p11 = scmp.ne.s32.totalorder %s93_s1, %s3462_s3  ;;  %p3468_p13 = scmp.lt.s32.totalorder %s3462_s3, %s3462_s3 }
  0x3e   :  { %p3469_p0 = por %p3468_p13, %p3467_p12 }
  0x40   :  { %p3470_p1 = pnand %p3469_p0, %p3463_p11 }
  0x42   :  { %3473 = shalt.err (!%p3470_p1)
}
  0x43   :  { %98 = dma.hbm_to_vmem [thread:$0]  %s4077_s6, 512, %s93_s1, [#allocation14], %s3508_s10, %s3508_s10, %s3509_s11  }
  0x44   :  { %3494 = dma.done.wait [#allocation5], 16  }
  0x45   :  { %3495 = vsyncadd [#allocation5], 4294967280 }
  0x46   :  { %3496 = dma.done.wait [#allocation3], 1024  }
  0x47   :  { %3497 = vsyncadd [#allocation3], 4294966272 }
  0x48   :  { %3498 = dma.done.wait [#allocation8], 1536  }
  0x49   :  { %3499 = vsyncadd [#allocation8], 4294965760 }
  0x4a   :  { %3500 = dma.done.wait [#allocation11], 1024  }
  0x4b   :  { %3501 = vsyncadd [#allocation11], 4294966272 }
  0x4c   :  { %3502 = dma.done.wait [#allocation14], 512  }
  0x4d   :  { %3503 = vsyncadd [#allocation14], 4294966784 }
  0x4e   :  { %122 = sfence }
  0x4f   :  { %v3604_v0 = vld [vmem:[#allocation9 + $0x18] sm:$0xff]  ;;  %v3515_v1 = vmov 0.0   ;;  %v3607_v2 = vld [vmem:[#allocation9 + $0x10] sm:$0xff]  ;;  %vm3516_vm0 = vmmov 0   ;;  %v3614_v3 = vld [vmem:[#allocation9 + $0x8] sm:$0xff]  ;;  %s3517_s5 = smov 64  }
  0x50   :  { %2904 = vmatprep.subr.mxu0 %v3515_v1  ;;  %2912 = vmatprep.mubr.msk.f32.mxu0 %vm3516_vm0, %v3515_v1  ;;  %v3620_v4 = vld [vmem:[#allocation9] sm:$0xff]  ;;  %s3518_s6 = smov 32   ;;  %vm123_vm1 = vcmask 261120   ;;  %v242_v23 = vld [vmem:[#allocation6 + $0x8] sm:$0xff]  ;;  %v344_v41 = vld [vmem:[#allocation6 + $0x10] sm:$0xff]  ;;  %s2736_s18 = sld [smem:[#allocation2 + $0x2]] }
  0x51   :  { %2905 = vmatpush3.msra.mxu0 %v3604_v0  ;;  %2915 = vmatprep.subr.mxu1 %v3515_v1  ;;  %v142_v5 = vld [vmem:[#allocation6] sm:$0xff]  ;;  %124 = vst.msk [vmem:[#allocation15] sm:$0xff] %vm123_vm1, %v3515_v1  ;;  %v446_v59 = vld [vmem:[#allocation6 + $0x18] sm:$0xff]  ;;  %s2742_s2 = sld [smem:[#allocation2 + $0x3]]  ;;  %s3519_s25 = smov [#allocation15]  }
  0x52   :  { %2906 = vmatprep.subr.mxu0 %v3515_v1  ;;  %2916 = vmatpush3.msra.mxu1 %v3604_v0  ;;  %s2748_s21 = sld [smem:[#allocation2 + $0x4]]  ;;  %s2694_s26 = sshll.u32 %s3519_s25, 4  ;;  %s2695_s26 = int_to_ptr.vmem [resolvable:$true] %s2694_s26 }
  0x53   :  { %2907 = vmatpush3.msra.mxu0 %v3607_v2  ;;  %2917 = vmatprep.subr.mxu1 %v3515_v1  ;;  %s2754_s23 = sld [smem:[#allocation2 + $0x5]]  ;;  %s3474_s27 = scalar_lea.vmem %s2695_s26, 1024 }
  0x54   :  { %2908 = vmatprep.subr.mxu0 %v3515_v1  ;;  %2918 = vmatpush3.msra.mxu1 %v3607_v2  ;;  %s2760_s24 = sld [smem:[#allocation2 + $0x6]]  ;;  %p3475_p8 = scmp.ne.s32.totalorder %s2695_s26, %s3474_s27 }
  0x55   :  { %2909 = vmatpush3.msra.mxu0 %v3614_v3  ;;  %2919 = vmatprep.subr.mxu1 %v3515_v1  ;;  %p3479_p9 = scmp.lt.s32.totalorder %s2695_s26, %s2695_s26  ;;  %p3480_p10 = scmp.lt.s32.totalorder %s3474_s27, %s3474_s27 }
  0x56   :  { %2910 = vmatprep.subr.mxu0 %v3515_v1  ;;  %2920 = vmatpush3.msra.mxu1 %v3614_v3  ;;  %p1474_p3 = scmp.ne.s32.totalorder %s2736_s18, 0 }
  0x57   :  { %2911 = vmatpush3.msra.mxu0 %v3620_v4  ;;  %2921 = vmatprep.subr.mxu1 %v3515_v1  ;;  %p1733_p4 = scmp.ne.s32.totalorder %s2742_s2, 0  ;;  %p3481_p11 = por %p3480_p10, %p3479_p9 }
  0x58   :  { %2913 = vmatmul.mubr.f32.vlgmr.msra.gmra.mxu0 %v3515_v1  ;;  %2922 = vmatpush3.msra.mxu1 %v3620_v4  ;;  %s1477_s19 = scalar_select %p1474_p3, 1, 0 }
  0x59   :  { %2923 = vmatprep.mubr.msk.f32.mxu1 %vm3516_vm0, %v3515_v1  ;;  %2926 = vmatprep.subr.mxu0 %v3515_v1  ;;  %s1736_s20 = scalar_select %p1733_p4, 1, 0 }
  0x5a   :  { %2927 = vmatpush3.msra.mxu0 %v3604_v0  ;;  %2934 = vmatprep.mubr.msk.f32.mxu0 %vm3516_vm0, %v3515_v1  ;;  %p1992_p5 = scmp.ne.s32.totalorder %s2748_s21, 0  ;;  %p2251_p6 = scmp.ne.s32.totalorder %s2754_s23, 0 }
  0x5b   :  { %2928 = vmatprep.subr.mxu0 %v3515_v1  ;;  %2937 = vmatprep.subr.mxu1 %v3515_v1  ;;  %p2510_p7 = scmp.ne.s32.totalorder %s2760_s24, 0  ;;  %p3482_p12 = pnand %p3481_p11, %p3475_p8 }
  0x5c   :  { %2929 = vmatpush3.msra.mxu0 %v3607_v2  ;;  %s1995_s22 = scalar_select %p1992_p5, 1, 0 }
  0x5d   :  { %2930 = vmatprep.subr.mxu0 %v3515_v1  ;;  %s2254_s4 = scalar_select %p2251_p6, 1, 0 }
  0x5e   :  { %2931 = vmatpush3.msra.mxu0 %v3614_v3  ;;  %s2513_s0 = scalar_select %p2510_p7, 1, 0 }
  0x5f   :  { %2932 = vmatprep.subr.mxu0 %v3515_v1 }
  0x60   :  { %2933 = vmatpush3.msra.mxu0 %v3620_v4 }
  0x61   :  { %2948 = vmatprep.subr.mxu0 %v3515_v1 }
 0x118   :  { %v212_v6 = vpop.f32.mrf.mxu0 }
 0x119   :  { %v216_v7 = vadd.f32 %v212_v6, %v142_v5 }
 0x11a   :  { %v2914_v8 = vpop.f32.mrf.mxu0 }
 0x11b   :  { %3226 = vtanh.f32 %v216_v7  ;;  %v2710_v10 = vmul.f32 -1.442695, %v216_v7 }
 0x11d   :  { %3228 = vpow2.f32 %v2710_v10 }
 0x128   :  { %v3227_v9 = vpop.eup %3226 }
 0x129   :  { %226 = vrot.lane.b32.xlu0 %v3227_v9, %s3517_s5 }
 0x12a   :  { %v3229_v11 = vpop.eup %3228 }
 0x12b   :  { %v220_v12 = vadd.f32 1.0, %v3229_v11 }
 0x12d   :  { %3230 = vrcp.f32 %v220_v12 }
 0x13a   :  { %v3231_v13 = vpop.eup %3230 }
 0x13b   :  { %v224_v16 = vmul.f32 0.0, %v3231_v13 }
 0x19b   :  { %v227_v14 = vpop.permute.xlu0 %226 }
 0x19c   :  { %v229_v15 = vmul.f32 %v3231_v13, %v227_v14 }
 0x19e   :  { %231 = vrot.lane.b32.xlu0 %v229_v15, %s3518_s6 }
 0x210   :  { %v232_v17 = vpop.permute.xlu0 %231 }
 0x211   :  { %v234_v18 = vadd.f32 %v232_v17, %v224_v16 }
 0x213   :  { %3232 = vtanh.f32 %v234_v18 }
 0x220   :  { %v3233_v19 = vpop.eup %3232 }
 0x221   :  { %237 = vrot.lane.b32.xlu1 %v3233_v19, %s3517_s5 }
 0x293   :  { %v238_v20 = vpop.permute.xlu1 %237 }
 0x294   :  { %v240_v21 = vmul.f32 %v3231_v13, %v238_v20 }
 0x296   :  { %244 = vrot.lane.b32.xlu1 %v240_v21, %s3518_s6 }
 0x308   :  { %v245_v22 = vpop.permute.xlu1 %244 }
 0x309   :  { %2924 = vmatmul.mubr.msk.f32.vlgmr.msra.gmra.mxu1 %vm123_vm1, %v245_v22 }
 0x30a   :  { %2938 = vmatpush3.msra.mxu1 %v3604_v0  ;;  %2945 = vmatprep.mubr.msk.f32.mxu1 %vm3516_vm0, %v3515_v1 }
 0x30b   :  { %2939 = vmatprep.subr.mxu1 %v3515_v1 }
 0x30c   :  { %2940 = vmatpush3.msra.mxu1 %v3607_v2 }
 0x30d   :  { %2941 = vmatprep.subr.mxu1 %v3515_v1 }
 0x30e   :  { %2942 = vmatpush3.msra.mxu1 %v3614_v3 }
 0x30f   :  { %2943 = vmatprep.subr.mxu1 %v3515_v1 }
 0x310   :  { %2944 = vmatpush3.msra.mxu1 %v3620_v4 }
 0x311   :  { %2959 = vmatprep.subr.mxu1 %v3515_v1 }
 0x3c9   :  { %v314_v24 = vpop.f32.mrf.mxu1 }
 0x3ca   :  { %v318_v25 = vadd.f32 %v314_v24, %v242_v23 }
 0x3cb   :  { %v2925_v26 = vpop.f32.mrf.mxu1 }
 0x3cc   :  { %3234 = vtanh.f32 %v318_v25  ;;  %v2712_v28 = vmul.f32 -1.442695, %v318_v25 }
 0x3ce   :  { %3236 = vpow2.f32 %v2712_v28 }
 0x3d9   :  { %v3235_v27 = vpop.eup %3234 }
 0x3da   :  { %328 = vrot.lane.b32.xlu0 %v3235_v27, %s3517_s5 }
 0x3db   :  { %v3237_v29 = vpop.eup %3236 }
 0x3dc   :  { %v322_v30 = vadd.f32 1.0, %v3237_v29 }
 0x3de   :  { %3238 = vrcp.f32 %v322_v30 }
 0x3eb   :  { %v3239_v31 = vpop.eup %3238 }
 0x3ec   :  { %v326_v34 = vmul.f32 %v3239_v31, %v234_v18  ;;  %v548_v18 = vld [vmem:[#allocation6 + $0x20] sm:$0xff] }
 0x44c   :  { %v329_v32 = vpop.permute.xlu0 %328 }
 0x44d   :  { %v331_v33 = vmul.f32 %v3239_v31, %v329_v32 }
 0x44f   :  { %333 = vrot.lane.b32.xlu1 %v331_v33, %s3518_s6 }
 0x4c1   :  { %v334_v35 = vpop.permute.xlu1 %333 }
 0x4c2   :  { %v336_v36 = vadd.f32 %v334_v35, %v326_v34 }
 0x4c4   :  { %3240 = vtanh.f32 %v336_v36 }
 0x4d1   :  { %v3241_v37 = vpop.eup %3240 }
 0x4d2   :  { %339 = vrot.lane.b32.xlu0 %v3241_v37, %s3517_s5 }
 0x544   :  { %v340_v38 = vpop.permute.xlu0 %339 }
 0x545   :  { %v342_v39 = vmul.f32 %v3239_v31, %v340_v38 }
 0x547   :  { %346 = vrot.lane.b32.xlu1 %v342_v39, %s3518_s6 }
 0x5b9   :  { %v347_v40 = vpop.permute.xlu1 %346 }
 0x5ba   :  { %2935 = vmatmul.mubr.msk.f32.vlgmr.msra.gmra.mxu0 %vm123_vm1, %v347_v40 }
 0x5bb   :  { %2949 = vmatpush3.msra.mxu0 %v3604_v0  ;;  %2956 = vmatprep.mubr.msk.f32.mxu0 %vm3516_vm0, %v3515_v1 }
 0x5bc   :  { %2950 = vmatprep.subr.mxu0 %v3515_v1 }
 0x5bd   :  { %2951 = vmatpush3.msra.mxu0 %v3607_v2 }
 0x5be   :  { %2952 = vmatprep.subr.mxu0 %v3515_v1 }
 0x5bf   :  { %2953 = vmatpush3.msra.mxu0 %v3614_v3 }
 0x5c0   :  { %2954 = vmatprep.subr.mxu0 %v3515_v1 }
 0x5c1   :  { %2955 = vmatpush3.msra.mxu0 %v3620_v4 }
 0x5c2   :  { %2970 = vmatprep.subr.mxu0 %v3515_v1 }
 0x67a   :  { %v416_v42 = vpop.f32.mrf.mxu0 }
 0x67b   :  { %v420_v43 = vadd.f32 %v416_v42, %v344_v41 }
 0x67c   :  { %v2936_v44 = vpop.f32.mrf.mxu0 }
 0x67d   :  { %3242 = vtanh.f32 %v420_v43  ;;  %v2714_v46 = vmul.f32 -1.442695, %v420_v43 }
 0x67f   :  { %3244 = vpow2.f32 %v2714_v46 }
 0x68a   :  { %v3243_v45 = vpop.eup %3242 }
 0x68b   :  { %430 = vrot.lane.b32.xlu0 %v3243_v45, %s3517_s5 }
 0x68c   :  { %v3245_v47 = vpop.eup %3244 }
 0x68d   :  { %v424_v48 = vadd.f32 1.0, %v3245_v47 }
 0x68f   :  { %3246 = vrcp.f32 %v424_v48 }
 0x69c   :  { %v3247_v49 = vpop.eup %3246 }
 0x69d   :  { %v428_v52 = vmul.f32 %v3247_v49, %v336_v36  ;;  %v650_v36 = vld [vmem:[#allocation6 + $0x28] sm:$0xff] }
 0x6fd   :  { %v431_v50 = vpop.permute.xlu0 %430 }
 0x6fe   :  { %v433_v51 = vmul.f32 %v3247_v49, %v431_v50  ;;  %v752_v50 = vld [vmem:[#allocation6 + $0x30] sm:$0xff] }
 0x700   :  { %435 = vrot.lane.b32.xlu1 %v433_v51, %s3518_s6 }
 0x772   :  { %v436_v53 = vpop.permute.xlu1 %435 }
 0x773   :  { %v438_v54 = vadd.f32 %v436_v53, %v428_v52 }
 0x775   :  { %3248 = vtanh.f32 %v438_v54 }
 0x782   :  { %v3249_v55 = vpop.eup %3248 }
 0x783   :  { %441 = vrot.lane.b32.xlu0 %v3249_v55, %s3517_s5 }
 0x7f5   :  { %v442_v56 = vpop.permute.xlu0 %441 }
 0x7f6   :  { %v444_v57 = vmul.f32 %v3247_v49, %v442_v56 }
 0x7f8   :  { %448 = vrot.lane.b32.xlu1 %v444_v57, %s3518_s6 }
 0x86a   :  { %v449_v58 = vpop.permute.xlu1 %448 }
 0x86b   :  { %2946 = vmatmul.mubr.msk.f32.vlgmr.msra.gmra.mxu1 %vm123_vm1, %v449_v58 }
 0x86c   :  { %2960 = vmatpush3.msra.mxu1 %v3604_v0  ;;  %2967 = vmatprep.mubr.msk.f32.mxu1 %vm3516_vm0, %v3515_v1 }
 0x86d   :  { %2961 = vmatprep.subr.mxu1 %v3515_v1 }
 0x86e   :  { %2962 = vmatpush3.msra.mxu1 %v3607_v2 }
 0x86f   :  { %2963 = vmatprep.subr.mxu1 %v3515_v1 }
 0x870   :  { %2964 = vmatpush3.msra.mxu1 %v3614_v3 }
 0x871   :  { %2965 = vmatprep.subr.mxu1 %v3515_v1 }
 0x872   :  { %2966 = vmatpush3.msra.mxu1 %v3620_v4 }
 0x873   :  { %2981 = vmatprep.subr.mxu1 %v3515_v1 }
 0x92b   :  { %v518_v60 = vpop.f32.mrf.mxu1 }
 0x92c   :  { %v522_v61 = vadd.f32 %v518_v60, %v446_v59 }
 0x92d   :  { %v2947_v62 = vpop.f32.mrf.mxu1 }
 0x92e   :  { %3250 = vtanh.f32 %v522_v61  ;;  %v2716_v5 = vmul.f32 -1.442695, %v522_v61 }
 0x930   :  { %3252 = vpow2.f32 %v2716_v5 }
 0x93b   :  { %v3251_v63 = vpop.eup %3250 }
 0x93c   :  { %532 = vrot.lane.b32.xlu0 %v3251_v63, %s3517_s5 }
 0x93d   :  { %v3253_v6 = vpop.eup %3252 }
 0x93e   :  { %v526_v7 = vadd.f32 1.0, %v3253_v6 }
 0x940   :  { %3254 = vrcp.f32 %v526_v7 }
 0x94d   :  { %v3255_v8 = vpop.eup %3254 }
 0x94e   :  { %v530_v11 = vmul.f32 %v3255_v8, %v438_v54 }
 0x9ae   :  { %v533_v9 = vpop.permute.xlu0 %532 }
 0x9af   :  { %v535_v10 = vmul.f32 %v3255_v8, %v533_v9  ;;  %v854_v9 = vld [vmem:[#allocation6 + $0x38] sm:$0xff] }
 0x9b1   :  { %537 = vrot.lane.b32.xlu1 %v535_v10, %s3518_s6 }
 0xa23   :  { %v538_v12 = vpop.permute.xlu1 %537 }
 0xa24   :  { %v540_v13 = vadd.f32 %v538_v12, %v530_v11 }
 0xa26   :  { %3256 = vtanh.f32 %v540_v13 }
 0xa33   :  { %v3257_v14 = vpop.eup %3256 }
 0xa34   :  { %543 = vrot.lane.b32.xlu0 %v3257_v14, %s3517_s5 }
 0xaa6   :  { %v544_v15 = vpop.permute.xlu0 %543 }
 0xaa7   :  { %v546_v16 = vmul.f32 %v3255_v8, %v544_v15 }
 0xaa9   :  { %550 = vrot.lane.b32.xlu1 %v546_v16, %s3518_s6 }
 0xb1b   :  { %v551_v17 = vpop.permute.xlu1 %550 }
 0xb1c   :  { %2957 = vmatmul.mubr.msk.f32.vlgmr.msra.gmra.mxu0 %vm123_vm1, %v551_v17 }
 0xb1d   :  { %2971 = vmatpush3.msra.mxu0 %v3604_v0  ;;  %2978 = vmatprep.mubr.msk.f32.mxu0 %vm3516_vm0, %v3515_v1 }
 0xb1e   :  { %2972 = vmatprep.subr.mxu0 %v3515_v1 }
 0xb1f   :  { %2973 = vmatpush3.msra.mxu0 %v3607_v2 }
 0xb20   :  { %2974 = vmatprep.subr.mxu0 %v3515_v1 }
 0xb21   :  { %2975 = vmatpush3.msra.mxu0 %v3614_v3 }
 0xb22   :  { %2976 = vmatprep.subr.mxu0 %v3515_v1 }
 0xb23   :  { %2977 = vmatpush3.msra.mxu0 %v3620_v4 }
 0xb24   :  { %2992 = vmatprep.subr.mxu0 %v3515_v1 }
 0xbdc   :  { %v620_v19 = vpop.f32.mrf.mxu0 }
 0xbdd   :  { %v624_v20 = vadd.f32 %v620_v19, %v548_v18 }
 0xbde   :  { %v2958_v21 = vpop.f32.mrf.mxu0 }
 0xbdf   :  { %3258 = vtanh.f32 %v624_v20  ;;  %v2718_v23 = vmul.f32 -1.442695, %v624_v20 }
 0xbe1   :  { %3260 = vpow2.f32 %v2718_v23  ;;  %v3738_v23 = vld [vmem:[#allocation10 + $0x18] sm:$0xff] }
 0xbec   :  { %v3259_v22 = vpop.eup %3258 }
 0xbed   :  { %634 = vrot.lane.b32.xlu0 %v3259_v22, %s3517_s5 }
 0xbee   :  { %v3261_v24 = vpop.eup %3260 }
 0xbef   :  { %v628_v25 = vadd.f32 1.0, %v3261_v24  ;;  %v3740_v24 = vld [vmem:[#allocation10 + $0x10] sm:$0xff] }
 0xbf1   :  { %3262 = vrcp.f32 %v628_v25  ;;  %v3744_v25 = vld [vmem:[#allocation10 + $0x8] sm:$0xff] }
 0xbfe   :  { %v3263_v26 = vpop.eup %3262 }
 0xbff   :  { %v632_v29 = vmul.f32 %v3263_v26, %v540_v13 }
 0xc5f   :  { %v635_v27 = vpop.permute.xlu0 %634 }
 0xc60   :  { %v637_v28 = vmul.f32 %v3263_v26, %v635_v27 }
 0xc62   :  { %639 = vrot.lane.b32.xlu1 %v637_v28, %s3518_s6 }
 0xcd4   :  { %v640_v30 = vpop.permute.xlu1 %639 }
 0xcd5   :  { %v642_v31 = vadd.f32 %v640_v30, %v632_v29 }
 0xcd7   :  { %3264 = vtanh.f32 %v642_v31 }
 0xce4   :  { %v3265_v32 = vpop.eup %3264 }
 0xce5   :  { %645 = vrot.lane.b32.xlu0 %v3265_v32, %s3517_s5 }
 0xd57   :  { %v646_v33 = vpop.permute.xlu0 %645 }
 0xd58   :  { %v648_v34 = vmul.f32 %v3263_v26, %v646_v33  ;;  %v3748_v26 = vld [vmem:[#allocation10] sm:$0xff] }
 0xd5a   :  { %652 = vrot.lane.b32.xlu1 %v648_v34, %s3518_s6 }
 0xdcc   :  { %v653_v35 = vpop.permute.xlu1 %652 }
 0xdcd   :  { %2968 = vmatmul.mubr.msk.f32.vlgmr.msra.gmra.mxu1 %vm123_vm1, %v653_v35 }
 0xdce   :  { %2982 = vmatpush3.msra.mxu1 %v3604_v0  ;;  %2989 = vmatprep.mubr.msk.f32.mxu1 %vm3516_vm0, %v3515_v1 }
 0xdcf   :  { %2983 = vmatprep.subr.mxu1 %v3515_v1 }
 0xdd0   :  { %2984 = vmatpush3.msra.mxu1 %v3607_v2 }
 0xdd1   :  { %2985 = vmatprep.subr.mxu1 %v3515_v1 }
 0xdd2   :  { %2986 = vmatpush3.msra.mxu1 %v3614_v3 }
 0xdd3   :  { %2987 = vmatprep.subr.mxu1 %v3515_v1 }
 0xdd4   :  { %2988 = vmatpush3.msra.mxu1 %v3620_v4 }
 0xdd5   :  { %3003 = vmatprep.subr.mxu1 %v3515_v1 }
 0xe8d   :  { %v722_v37 = vpop.f32.mrf.mxu1 }
 0xe8e   :  { %v726_v0 = vadd.f32 %v722_v37, %v650_v36 }
 0xe8f   :  { %v2969_v38 = vpop.f32.mrf.mxu1 }
 0xe90   :  { %3266 = vtanh.f32 %v726_v0  ;;  %v2720_v40 = vmul.f32 -1.442695, %v726_v0 }
 0xe92   :  { %3268 = vpow2.f32 %v2720_v40 }
 0xe9d   :  { %v3267_v39 = vpop.eup %3266 }
 0xe9e   :  { %736 = vrot.lane.b32.xlu0 %v3267_v39, %s3517_s5 }
 0xe9f   :  { %v3269_v2 = vpop.eup %3268 }
 0xea0   :  { %v730_v41 = vadd.f32 1.0, %v3269_v2 }
 0xea2   :  { %3270 = vrcp.f32 %v730_v41 }
 0xeaf   :  { %v3271_v3 = vpop.eup %3270 }
 0xeb0   :  { %v734_v4 = vmul.f32 %v3271_v3, %v642_v31  ;;  %v957_v31 = vld [vmem:[#allocation7] sm:$0xff] }
 0xf10   :  { %v737_v42 = vpop.permute.xlu0 %736 }
 0xf11   :  { %v739_v43 = vmul.f32 %v3271_v3, %v737_v42  ;;  %v3764_v42 = vld [vmem:[#allocation13 + $0x18] sm:$0xff] }
 0xf13   :  { %741 = vrot.lane.b32.xlu1 %v739_v43, %s3518_s6  ;;  %v3766_v43 = vld [vmem:[#allocation13 + $0x10] sm:$0xff] }
 0xf85   :  { %v742_v44 = vpop.permute.xlu1 %741 }
 0xf86   :  { %v744_v45 = vadd.f32 %v742_v44, %v734_v4  ;;  %v3770_v4 = vld [vmem:[#allocation13 + $0x8] sm:$0xff]  ;;  %v3774_v44 = vld [vmem:[#allocation13] sm:$0xff] }
 0xf88   :  { %3272 = vtanh.f32 %v744_v45 }
 0xf95   :  { %v3273_v46 = vpop.eup %3272 }
 0xf96   :  { %747 = vrot.lane.b32.xlu0 %v3273_v46, %s3517_s5 }
0x1008   :  { %v748_v47 = vpop.permute.xlu0 %747 }
0x1009   :  { %v750_v48 = vmul.f32 %v3271_v3, %v748_v47 }
0x100b   :  { %754 = vrot.lane.b32.xlu1 %v750_v48, %s3518_s6 }
0x107d   :  { %v755_v49 = vpop.permute.xlu1 %754 }
0x107e   :  { %2979 = vmatmul.mubr.msk.f32.vlgmr.msra.gmra.mxu0 %vm123_vm1, %v755_v49  ;;  %v3796_v49 = vld [vmem:[#allocation12 + $0x18] sm:$0xff] }
0x107f   :  { %3000 = vmatprep.mubr.msk.f32.mxu0 %vm3516_vm0, %v3515_v1  ;;  %2993 = vmatpush3.msra.mxu0 %v3738_v23 }
0x1080   :  { %2994 = vmatprep.subr.mxu0 %v3515_v1 }
0x1081   :  { %2995 = vmatpush3.msra.mxu0 %v3740_v24 }
0x1082   :  { %2996 = vmatprep.subr.mxu0 %v3515_v1 }
0x1083   :  { %2997 = vmatpush3.msra.mxu0 %v3744_v25 }
0x1084   :  { %2998 = vmatprep.subr.mxu0 %v3515_v1 }
0x1085   :  { %2999 = vmatpush3.msra.mxu0 %v3748_v26 }
0x1086   :  { %3014 = vmatprep.subr.mxu0 %v3515_v1 }
0x113e   :  { %v824_v51 = vpop.f32.mrf.mxu0 }
0x113f   :  { %v828_v52 = vadd.f32 %v824_v51, %v752_v50  ;;  %v3798_v50 = vld [vmem:[#allocation12 + $0x10] sm:$0xff]  ;;  %v3803_v51 = vld [vmem:[#allocation12 + $0x8] sm:$0xff] }
0x1140   :  { %v2980_v53 = vpop.f32.mrf.mxu0 }
0x1141   :  { %3274 = vtanh.f32 %v828_v52  ;;  %v2722_v55 = vmul.f32 -1.442695, %v828_v52  ;;  %v3817_v52 = vld [vmem:[%s4078_s7] sm:$0xff]  ;;  %s2730_s7 = sld [smem:[#allocation2 + $0x1]] }
0x1143   :  { %3276 = vpow2.f32 %v2722_v55 }
0x1147   :  { %p1215_p2 = scmp.ne.s32.totalorder %s2730_s7, 0 }
0x1149   :  { %s1218_s17 = scalar_select %p1215_p2, 1, 0 }
0x114e   :  { %v3275_v54 = vpop.eup %3274 }
0x114f   :  { %838 = vrot.lane.b32.xlu0 %v3275_v54, %s3517_s5 }
0x1150   :  { %v3277_v56 = vpop.eup %3276 }
0x1151   :  { %v832_v57 = vadd.f32 1.0, %v3277_v56 }
0x1153   :  { %3278 = vrcp.f32 %v832_v57 }
0x1160   :  { %v3279_v58 = vpop.eup %3278 }
0x1161   :  { %v836_v61 = vmul.f32 %v3279_v58, %v744_v45 }
0x11c1   :  { %v839_v59 = vpop.permute.xlu0 %838 }
0x11c2   :  { %v841_v60 = vmul.f32 %v3279_v58, %v839_v59  ;;  %v3822_v59 = vld [vmem:[#allocation12] sm:$0xff] }
0x11c4   :  { %843 = vrot.lane.b32.xlu1 %v841_v60, %s3518_s6  ;;  %v955_v60 = vlaneseq }
0x1236   :  { %v844_v62 = vpop.permute.xlu1 %843 }
0x1237   :  { %v846_v63 = vadd.f32 %v844_v62, %v836_v61  ;;  %v3828_v61 = vand.u32 127, %v955_v60 }
0x1239   :  { %3280 = vtanh.f32 %v846_v63 }
0x1246   :  { %v3281_v5 = vpop.eup %3280 }
0x1247   :  { %849 = vrot.lane.b32.xlu0 %v3281_v5, %s3517_s5  ;;  %v1219_v5 = vstv %s1218_s17 }
0x1248   :  { %vm1220_vm3 = vcmp.eq.s32.totalorder %v1219_v5, 1 }
0x12b9   :  { %v850_v6 = vpop.permute.xlu0 %849 }
0x12ba   :  { %v852_v7 = vmul.f32 %v3279_v58, %v850_v6  ;;  %v1217_v6 = vld [vmem:[#allocation7 + $0x8] sm:$0xff] }
0x12bc   :  { %856 = vrot.lane.b32.xlu1 %v852_v7, %s3518_s6 }
0x132e   :  { %v857_v8 = vpop.permute.xlu1 %856 }
0x132f   :  { %2990 = vmatmul.mubr.msk.f32.vlgmr.msra.gmra.mxu1 %vm123_vm1, %v857_v8 }
0x1330   :  { %3011 = vmatprep.mubr.msk.f32.mxu1 %vm3516_vm0, %v3515_v1  ;;  %3004 = vmatpush3.msra.mxu1 %v3764_v42 }
0x1331   :  { %3005 = vmatprep.subr.mxu1 %v3515_v1 }
0x1332   :  { %3006 = vmatpush3.msra.mxu1 %v3766_v43 }
0x1333   :  { %3007 = vmatprep.subr.mxu1 %v3515_v1 }
0x1334   :  { %3008 = vmatpush3.msra.mxu1 %v3770_v4 }
0x1335   :  { %3009 = vmatprep.subr.mxu1 %v3515_v1 }
0x1336   :  { %3010 = vmatpush3.msra.mxu1 %v3774_v44 }
0x1337   :  { %3025 = vmatprep.subr.mxu1 %v3515_v1 }
0x13ef   :  { %v926_v10 = vpop.f32.mrf.mxu1 }
0x13f0   :  { %v930_v11 = vadd.f32 %v926_v10, %v854_v9 }
0x13f1   :  { %v2991_v12 = vpop.f32.mrf.mxu1 }
0x13f2   :  { %3282 = vtanh.f32 %v930_v11  ;;  %v2724_v14 = vmul.f32 -1.442695, %v930_v11 }
0x13f4   :  { %3284 = vpow2.f32 %v2724_v14 }
0x13ff   :  { %v3283_v13 = vpop.eup %3282 }
0x1400   :  { %940 = vrot.lane.b32.xlu0 %v3283_v13, %s3517_s5 }
0x1401   :  { %v3285_v15 = vpop.eup %3284 }
0x1402   :  { %v934_v16 = vadd.f32 1.0, %v3285_v15 }
0x1404   :  { %3286 = vrcp.f32 %v934_v16 }
0x1411   :  { %v3287_v17 = vpop.eup %3286 }
0x1412   :  { %v938_v20 = vmul.f32 %v3287_v17, %v846_v63 }
0x1472   :  { %v941_v18 = vpop.permute.xlu0 %940 }
0x1473   :  { %v943_v19 = vmul.f32 %v3287_v17, %v941_v18 }
0x1475   :  { %945 = vrot.lane.b32.xlu1 %v943_v19, %s3518_s6 }
0x14e7   :  { %v946_v21 = vpop.permute.xlu1 %945 }
0x14e8   :  { %v948_v22 = vadd.f32 %v946_v21, %v938_v20 }
0x14ea   :  { %3288 = vtanh.f32 %v948_v22 }
0x14f7   :  { %v3289_v27 = vpop.eup %3288 }
0x14f8   :  { %951 = vrot.lane.b32.xlu0 %v3289_v27, %s3517_s5 }
0x156a   :  { %v952_v28 = vpop.permute.xlu0 %951 }
0x156b   :  { %v954_v29 = vmul.f32 %v3287_v17, %v952_v28 }
0x156d   :  { %959 = vrot.lane.b32.xlu1 %v954_v29, %s3518_s6 }
0x15df   :  { %v960_v30 = vpop.permute.xlu1 %959 }
0x15e0   :  { %3001 = vmatmul.mubr.msk.f32.vlgmr.msra.gmra.mxu0 %vm123_vm1, %v960_v30 }
0x15e1   :  { %3022 = vmatprep.mubr.msk.f32.mxu0 %vm3516_vm0, %v3515_v1  ;;  %3015 = vmatpush3.msra.mxu0 %v3796_v49 }
0x15e2   :  { %3016 = vmatprep.subr.mxu0 %v3515_v1 }
0x15e3   :  { %3017 = vmatpush3.msra.mxu0 %v3798_v50 }
0x15e4   :  { %3018 = vmatprep.subr.mxu0 %v3515_v1 }
0x15e5   :  { %3019 = vmatpush3.msra.mxu0 %v3803_v51 }
0x15e6   :  { %3020 = vmatprep.subr.mxu0 %v3515_v1 }
0x15e7   :  { %3021 = vmatpush3.msra.mxu0 %v3822_v59 }
0x15e8   :  { %3036 = vmatprep.subr.mxu0 %v3515_v1 }
0x16a0   :  { %v1029_v32 = vpop.f32.mrf.mxu0 }
0x16a1   :  { %v1033_v33 = vadd.f32 %v1029_v32, %v957_v31 }
0x16a2   :  { %v3002_v34 = vpop.f32.mrf.mxu0 }
0x16a3   :  { %3290 = vtanh.f32 %v1033_v33  ;;  %v2726_v36 = vmul.f32 -1.442695, %v1033_v33 }
0x16a5   :  { %3292 = vpow2.f32 %v2726_v36 }
0x16b0   :  { %v3291_v35 = vpop.eup %3290 }
0x16b1   :  { %1043 = vrot.lane.b32.xlu0 %v3291_v35, %s3517_s5 }
0x16b2   :  { %v3293_v37 = vpop.eup %3292 }
0x16b3   :  { %v1037_v0 = vadd.f32 1.0, %v3293_v37  ;;  %v1478_v37 = vstv %s1477_s19 }
0x16b4   :  { %vm1479_vm5 = vcmp.eq.s32.totalorder %v1478_v37, 1 }
0x16b5   :  { %3294 = vrcp.f32 %v1037_v0  ;;  %v1476_v0 = vld [vmem:[#allocation7 + $0x10] sm:$0xff] }
0x16c2   :  { %v3295_v38 = vpop.eup %3294 }
0x16c3   :  { %v1041_v2 = vmul.f32 %v3295_v38, %v948_v22 }
0x1723   :  { %v1044_v39 = vpop.permute.xlu0 %1043 }
0x1724   :  { %v1046_v40 = vmul.f32 %v3295_v38, %v1044_v39 }
0x1726   :  { %1048 = vrot.lane.b32.xlu1 %v1046_v40, %s3518_s6 }
0x1798   :  { %v1049_v41 = vpop.permute.xlu1 %1048 }
0x1799   :  { %v3761_v3 = vadd.f32 %v1049_v41, %v1041_v2 }
0x179b   :  { %3296 = vtanh.f32 %v3761_v3 }
0x17a8   :  { %v3297_v45 = vpop.eup %3296 }
0x17a9   :  { %1054 = vrot.lane.b32.xlu0 %v3297_v45, %s3517_s5 }
0x181b   :  { %v1055_v46 = vpop.permute.xlu0 %1054 }
0x181c   :  { %v1057_v47 = vmul.f32 %v3295_v38, %v1055_v46 }
0x181e   :  { %1059 = vrot.lane.b32.xlu1 %v1057_v47, %s3518_s6 }
0x1890   :  { %v1060_v48 = vpop.permute.xlu1 %1059 }
0x1891   :  { %3012 = vmatmul.mubr.msk.f32.vlgmr.msra.gmra.mxu1 %vm123_vm1, %v1060_v48 }
0x1892   :  { %3026 = vmatpush3.msra.mxu1 %v3738_v23  ;;  %3033 = vmatprep.mubr.msk.f32.mxu1 %vm3516_vm0, %v3515_v1 }
0x1893   :  { %3027 = vmatprep.subr.mxu1 %v3515_v1 }
0x1894   :  { %3028 = vmatpush3.msra.mxu1 %v3740_v24 }
0x1895   :  { %3029 = vmatprep.subr.mxu1 %v3515_v1 }
0x1896   :  { %3030 = vmatpush3.msra.mxu1 %v3744_v25 }
0x1897   :  { %3031 = vmatprep.subr.mxu1 %v3515_v1 }
0x1898   :  { %3032 = vmatpush3.msra.mxu1 %v3748_v26 }
0x1899   :  { %3034 = vmatmul.mubr.msk.f32.vlgmr.msra.gmra.mxu1 %vm123_vm1, %v1060_v48  ;;  %3047 = vmatprep.subr.mxu1 %v3515_v1 }
0x189a   :  { %3055 = vmatprep.mubr.msk.f32.mxu1 %vm3516_vm0, %v3515_v1  ;;  %3048 = vmatpush3.msra.mxu1 %v3796_v49 }
0x189b   :  { %3049 = vmatprep.subr.mxu1 %v3515_v1 }
0x189c   :  { %3050 = vmatpush3.msra.mxu1 %v3798_v50 }
0x189d   :  { %3051 = vmatprep.subr.mxu1 %v3515_v1 }
0x189e   :  { %3052 = vmatpush3.msra.mxu1 %v3803_v51 }
0x189f   :  { %3053 = vmatprep.subr.mxu1 %v3515_v1 }
0x18a0   :  { %3054 = vmatpush3.msra.mxu1 %v3822_v59 }
0x18a1   :  { %3069 = vmatprep.subr.mxu1 %v3515_v1 }
0x1951   :  { %v1129_v53 = vpop.f32.mrf.mxu1 }
0x1952   :  { %v1130_v54 = vadd.f32 %v1129_v53, %v3817_v52 }
0x1953   :  { %v3013_v55 = vpop.f32.mrf.mxu1 }
0x1954   :  { %1134 = vst.msk [vmem:[#allocation15 + $0x8] sm:$0xff] %vm123_vm1, %v1130_v54  ;;  %v1135_v56 = vsel %vm123_vm1, %v1130_v54, -inf }
0x1955   :  { %1136 = vmax.index.xlane.f32.xlu0 %v1135_v56 }
0x1959   :  { %v1288_v57 = vpop.f32.mrf.mxu1 }
0x195b   :  { %v3035_v58 = vpop.f32.mrf.mxu1 }
0x19de   :  { %v1137_v62 = vpop.xlane.xlu0 %1136 }
0x19df   :  { %vm1138_vm2 = vcmp.eq.s32.totalorder %v3828_v61, %v1137_v62 }
0x19e0   :  { %v2728_v63 = vsel %vm1138_vm2, 1.0, %v3515_v1 }
0x19e1   :  { %3023 = vmatmul.mubr.msk.f32.vlgmr.msra.gmra.mxu0 %vm123_vm1, %v2728_v63 }
0x19e2   :  { %3037 = vmatpush3.msra.mxu0 %v3764_v42  ;;  %3044 = vmatprep.mubr.msk.f32.mxu0 %vm3516_vm0, %v3515_v1 }
0x19e3   :  { %3038 = vmatprep.subr.mxu0 %v3515_v1 }
0x19e4   :  { %3039 = vmatpush3.msra.mxu0 %v3766_v43 }
0x19e5   :  { %3040 = vmatprep.subr.mxu0 %v3515_v1 }
0x19e6   :  { %3041 = vmatpush3.msra.mxu0 %v3770_v4 }
0x19e7   :  { %3042 = vmatprep.subr.mxu0 %v3515_v1 }
0x19e8   :  { %3043 = vmatpush3.msra.mxu0 %v3774_v44 }
0x19e9   :  { %3058 = vmatprep.subr.mxu0 %v3515_v1 }
0x1aa1   :  { %v1210_v7 = vpop.f32.mrf.mxu0 }
0x1aa2   :  { %v1221_v8 = vsel %vm1220_vm3, %v1217_v6, %v1210_v7 }
0x1aa3   :  { %v1292_v9 = vadd.f32 %v1288_v57, %v1221_v8  ;;  %v3024_v10 = vpop.f32.mrf.mxu0 }
0x1aa5   :  { %3298 = vtanh.f32 %v1292_v9  ;;  %v2732_v12 = vmul.f32 -1.442695, %v1292_v9 }
0x1aa7   :  { %3300 = vpow2.f32 %v2732_v12  ;;  %v1737_v12 = vstv %s1736_s20 }
0x1aa8   :  { %vm1738_vm7 = vcmp.eq.s32.totalorder %v1737_v12, 1 }
0x1ab2   :  { %v3299_v11 = vpop.eup %3298 }
0x1ab3   :  { %1302 = vrot.lane.b32.xlu1 %v3299_v11, %s3517_s5 }
0x1ab4   :  { %v3301_v13 = vpop.eup %3300 }
0x1ab5   :  { %v1296_v14 = vadd.f32 1.0, %v3301_v13  ;;  %v1735_v13 = vld [vmem:[#allocation7 + $0x18] sm:$0xff] }
0x1ab7   :  { %3302 = vrcp.f32 %v1296_v14 }
0x1ac4   :  { %v3303_v15 = vpop.eup %3302 }
0x1ac5   :  { %v1300_v18 = vmul.f32 %v3303_v15, %v3761_v3 }
0x1b25   :  { %v1303_v16 = vpop.permute.xlu1 %1302 }
0x1b26   :  { %v1305_v17 = vmul.f32 %v3303_v15, %v1303_v16 }
0x1b28   :  { %1307 = vrot.lane.b32.xlu1 %v1305_v17, %s3518_s6 }
0x1b9a   :  { %v1308_v19 = vpop.permute.xlu1 %1307 }
0x1b9b   :  { %v3846_v20 = vadd.f32 %v1308_v19, %v1300_v18 }
0x1b9d   :  { %3304 = vtanh.f32 %v3846_v20 }
0x1baa   :  { %v3305_v21 = vpop.eup %3304 }
0x1bab   :  { %1313 = vrot.lane.b32.xlu1 %v3305_v21, %s3517_s5 }
0x1c1d   :  { %v1314_v22 = vpop.permute.xlu1 %1313 }
0x1c1e   :  { %v1316_v27 = vmul.f32 %v3303_v15, %v1314_v22 }
0x1c20   :  { %1318 = vrot.lane.b32.xlu1 %v1316_v27, %s3518_s6 }
0x1c92   :  { %v1319_v28 = vpop.permute.xlu1 %1318 }
0x1c93   :  { %3045 = vmatmul.mubr.msk.f32.vlgmr.msra.gmra.mxu0 %vm123_vm1, %v1319_v28 }
0x1c94   :  { %3059 = vmatpush3.msra.mxu0 %v3738_v23  ;;  %3066 = vmatprep.mubr.msk.f32.mxu0 %vm3516_vm0, %v3515_v1 }
0x1c95   :  { %3060 = vmatprep.subr.mxu0 %v3515_v1 }
0x1c96   :  { %3061 = vmatpush3.msra.mxu0 %v3740_v24 }
0x1c97   :  { %3062 = vmatprep.subr.mxu0 %v3515_v1 }
0x1c98   :  { %3063 = vmatpush3.msra.mxu0 %v3744_v25 }
0x1c99   :  { %3064 = vmatprep.subr.mxu0 %v3515_v1 }
0x1c9a   :  { %3065 = vmatpush3.msra.mxu0 %v3748_v26 }
0x1c9b   :  { %3067 = vmatmul.mubr.msk.f32.vlgmr.msra.gmra.mxu0 %vm123_vm1, %v1319_v28  ;;  %3080 = vmatprep.subr.mxu0 %v3515_v1 }
0x1c9c   :  { %3081 = vmatpush3.msra.mxu0 %v3796_v49  ;;  %3088 = vmatprep.mubr.msk.f32.mxu0 %vm3516_vm0, %v3515_v1 }
0x1c9d   :  { %3082 = vmatprep.subr.mxu0 %v3515_v1 }
0x1c9e   :  { %3083 = vmatpush3.msra.mxu0 %v3798_v50 }
0x1c9f   :  { %3084 = vmatprep.subr.mxu0 %v3515_v1 }
0x1ca0   :  { %3085 = vmatpush3.msra.mxu0 %v3803_v51 }
0x1ca1   :  { %3086 = vmatprep.subr.mxu0 %v3515_v1 }
0x1ca2   :  { %3087 = vmatpush3.msra.mxu0 %v3822_v59 }
0x1ca3   :  { %3102 = vmatprep.subr.mxu0 %v3515_v1 }
0x1d53   :  { %v1388_v29 = vpop.f32.mrf.mxu0 }
0x1d54   :  { %v1389_v30 = vadd.f32 %v1388_v29, %v3817_v52 }
0x1d55   :  { %v3046_v31 = vpop.f32.mrf.mxu0 }
0x1d56   :  { %1393 = vst.msk [vmem:[#allocation15 + $0x10] sm:$0xff] %vm123_vm1, %v1389_v30  ;;  %v1394_v32 = vsel %vm123_vm1, %v1389_v30, -inf }
0x1d57   :  { %1395 = vmax.index.xlane.f32.xlu1 %v1394_v32 }
0x1d5b   :  { %v1547_v33 = vpop.f32.mrf.mxu0 }
0x1d5d   :  { %v3068_v34 = vpop.f32.mrf.mxu0 }
0x1de0   :  { %v1396_v35 = vpop.xlane.xlu1 %1395 }
0x1de1   :  { %vm1397_vm4 = vcmp.eq.s32.totalorder %v3828_v61, %v1396_v35 }
0x1de2   :  { %v2734_v36 = vsel %vm1397_vm4, 1.0, %v3515_v1 }
0x1de3   :  { %3056 = vmatmul.mubr.msk.f32.vlgmr.msra.gmra.mxu1 %vm123_vm1, %v2734_v36 }
0x1de4   :  { %3070 = vmatpush3.msra.mxu1 %v3764_v42  ;;  %3077 = vmatprep.mubr.msk.f32.mxu1 %vm3516_vm0, %v3515_v1 }
0x1de5   :  { %3071 = vmatprep.subr.mxu1 %v3515_v1 }
0x1de6   :  { %3072 = vmatpush3.msra.mxu1 %v3766_v43 }
0x1de7   :  { %3073 = vmatprep.subr.mxu1 %v3515_v1 }
0x1de8   :  { %3074 = vmatpush3.msra.mxu1 %v3770_v4 }
0x1de9   :  { %3075 = vmatprep.subr.mxu1 %v3515_v1 }
0x1dea   :  { %3076 = vmatpush3.msra.mxu1 %v3774_v44 }
0x1deb   :  { %3091 = vmatprep.subr.mxu1 %v3515_v1 }
0x1ea3   :  { %v1469_v38 = vpop.f32.mrf.mxu1 }
0x1ea4   :  { %v1480_v39 = vsel %vm1479_vm5, %v1476_v0, %v1469_v38 }
0x1ea5   :  { %v1551_v40 = vadd.f32 %v1547_v33, %v1480_v39  ;;  %v3057_v2 = vpop.f32.mrf.mxu1 }
0x1ea7   :  { %3306 = vtanh.f32 %v1551_v40  ;;  %v2738_v3 = vmul.f32 -1.442695, %v1551_v40 }
0x1ea9   :  { %3308 = vpow2.f32 %v2738_v3  ;;  %v1996_v3 = vstv %s1995_s22 }
0x1eaa   :  { %vm1997_vm9 = vcmp.eq.s32.totalorder %v1996_v3, 1 }
0x1eb4   :  { %v3307_v41 = vpop.eup %3306 }
0x1eb5   :  { %1561 = vrot.lane.b32.xlu0 %v3307_v41, %s3517_s5 }
0x1eb6   :  { %v3309_v45 = vpop.eup %3308 }
0x1eb7   :  { %v1555_v46 = vadd.f32 1.0, %v3309_v45  ;;  %v1994_v45 = vld [vmem:[#allocation7 + $0x20] sm:$0xff] }
0x1eb9   :  { %3310 = vrcp.f32 %v1555_v46 }
0x1ec6   :  { %v3311_v47 = vpop.eup %3310 }
0x1ec7   :  { %v1559_v54 = vmul.f32 %v3311_v47, %v3846_v20 }
0x1f27   :  { %v1562_v48 = vpop.permute.xlu0 %1561 }
0x1f28   :  { %v1564_v53 = vmul.f32 %v3311_v47, %v1562_v48 }
0x1f2a   :  { %1566 = vrot.lane.b32.xlu1 %v1564_v53, %s3518_s6 }
0x1f9c   :  { %v1567_v55 = vpop.permute.xlu1 %1566 }
0x1f9d   :  { %v3892_v56 = vadd.f32 %v1567_v55, %v1559_v54 }
0x1f9f   :  { %3312 = vtanh.f32 %v3892_v56 }
0x1fac   :  { %v3313_v57 = vpop.eup %3312 }
0x1fad   :  { %1572 = vrot.lane.b32.xlu0 %v3313_v57, %s3517_s5 }
0x201f   :  { %v1573_v58 = vpop.permute.xlu0 %1572 }
0x2020   :  { %v1575_v60 = vmul.f32 %v3311_v47, %v1573_v58 }
0x2022   :  { %1577 = vrot.lane.b32.xlu0 %v1575_v60, %s3518_s6 }
0x2094   :  { %v1578_v62 = vpop.permute.xlu0 %1577 }
0x2095   :  { %3078 = vmatmul.mubr.msk.f32.vlgmr.msra.gmra.mxu1 %vm123_vm1, %v1578_v62 }
0x2096   :  { %3092 = vmatpush3.msra.mxu1 %v3738_v23  ;;  %3099 = vmatprep.mubr.msk.f32.mxu1 %vm3516_vm0, %v3515_v1 }
0x2097   :  { %3093 = vmatprep.subr.mxu1 %v3515_v1 }
0x2098   :  { %3094 = vmatpush3.msra.mxu1 %v3740_v24 }
0x2099   :  { %3095 = vmatprep.subr.mxu1 %v3515_v1 }
0x209a   :  { %3096 = vmatpush3.msra.mxu1 %v3744_v25 }
0x209b   :  { %3097 = vmatprep.subr.mxu1 %v3515_v1 }
0x209c   :  { %3098 = vmatpush3.msra.mxu1 %v3748_v26 }
0x209d   :  { %3100 = vmatmul.mubr.msk.f32.vlgmr.msra.gmra.mxu1 %vm123_vm1, %v1578_v62  ;;  %3113 = vmatprep.subr.mxu1 %v3515_v1 }
0x209e   :  { %3114 = vmatpush3.msra.mxu1 %v3796_v49  ;;  %3121 = vmatprep.mubr.msk.f32.mxu1 %vm3516_vm0, %v3515_v1 }
0x209f   :  { %3115 = vmatprep.subr.mxu1 %v3515_v1 }
0x20a0   :  { %3116 = vmatpush3.msra.mxu1 %v3798_v50 }
0x20a1   :  { %3117 = vmatprep.subr.mxu1 %v3515_v1 }
0x20a2   :  { %3118 = vmatpush3.msra.mxu1 %v3803_v51 }
0x20a3   :  { %3119 = vmatprep.subr.mxu1 %v3515_v1 }
0x20a4   :  { %3120 = vmatpush3.msra.mxu1 %v3822_v59 }
0x20a5   :  { %3135 = vmatprep.subr.mxu1 %v3515_v1 }
0x2155   :  { %v1647_v63 = vpop.f32.mrf.mxu1 }
0x2156   :  { %v1648_v5 = vadd.f32 %v1647_v63, %v3817_v52 }
0x2157   :  { %v3079_v6 = vpop.f32.mrf.mxu1 }
0x2158   :  { %1652 = vst.msk [vmem:[#allocation15 + $0x18] sm:$0xff] %vm123_vm1, %v1648_v5  ;;  %v1653_v7 = vsel %vm123_vm1, %v1648_v5, -inf }
0x2159   :  { %1654 = vmax.index.xlane.f32.xlu0 %v1653_v7 }
0x215d   :  { %v1806_v8 = vpop.f32.mrf.mxu1 }
0x215f   :  { %v3101_v9 = vpop.f32.mrf.mxu1 }
0x21e2   :  { %v1655_v10 = vpop.xlane.xlu0 %1654 }
0x21e3   :  { %vm1656_vm6 = vcmp.eq.s32.totalorder %v3828_v61, %v1655_v10 }
0x21e4   :  { %v2740_v11 = vsel %vm1656_vm6, 1.0, %v3515_v1 }
0x21e5   :  { %3089 = vmatmul.mubr.msk.f32.vlgmr.msra.gmra.mxu0 %vm123_vm1, %v2740_v11 }
0x21e6   :  { %3103 = vmatpush3.msra.mxu0 %v3764_v42  ;;  %3110 = vmatprep.mubr.msk.f32.mxu0 %vm3516_vm0, %v3515_v1 }
0x21e7   :  { %3104 = vmatprep.subr.mxu0 %v3515_v1 }
0x21e8   :  { %3105 = vmatpush3.msra.mxu0 %v3766_v43 }
0x21e9   :  { %3106 = vmatprep.subr.mxu0 %v3515_v1 }
0x21ea   :  { %3107 = vmatpush3.msra.mxu0 %v3770_v4 }
0x21eb   :  { %3108 = vmatprep.subr.mxu0 %v3515_v1 }
0x21ec   :  { %3109 = vmatpush3.msra.mxu0 %v3774_v44 }
0x21ed   :  { %3124 = vmatprep.subr.mxu0 %v3515_v1 }
0x22a5   :  { %v1728_v14 = vpop.f32.mrf.mxu0 }
0x22a6   :  { %v1739_v15 = vsel %vm1738_vm7, %v1735_v13, %v1728_v14 }
0x22a7   :  { %v1810_v16 = vadd.f32 %v1806_v8, %v1739_v15  ;;  %v3090_v17 = vpop.f32.mrf.mxu0 }
0x22a9   :  { %3314 = vtanh.f32 %v1810_v16  ;;  %v2744_v19 = vmul.f32 -1.442695, %v1810_v16  ;;  %v2253_v16 = vld [vmem:[#allocation7 + $0x28] sm:$0xff] }
0x22ab   :  { %3316 = vpow2.f32 %v2744_v19 }
0x22b6   :  { %v3315_v18 = vpop.eup %3314 }
0x22b7   :  { %1820 = vrot.lane.b32.xlu1 %v3315_v18, %s3517_s5 }
0x22b8   :  { %v3317_v20 = vpop.eup %3316 }
0x22b9   :  { %v1814_v21 = vadd.f32 1.0, %v3317_v20 }
0x22bb   :  { %3318 = vrcp.f32 %v1814_v21 }
0x22c8   :  { %v3319_v22 = vpop.eup %3318 }
0x22c9   :  { %v1818_v29 = vmul.f32 %v3319_v22, %v3892_v56 }
0x2329   :  { %v1821_v27 = vpop.permute.xlu1 %1820 }
0x232a   :  { %v1823_v28 = vmul.f32 %v3319_v22, %v1821_v27 }
0x232c   :  { %1825 = vrot.lane.b32.xlu1 %v1823_v28, %s3518_s6 }
0x239e   :  { %v1826_v30 = vpop.permute.xlu1 %1825 }
0x239f   :  { %v3938_v31 = vadd.f32 %v1826_v30, %v1818_v29 }
0x23a1   :  { %3320 = vtanh.f32 %v3938_v31 }
0x23ae   :  { %v3321_v32 = vpop.eup %3320 }
0x23af   :  { %1831 = vrot.lane.b32.xlu1 %v3321_v32, %s3517_s5 }
0x2421   :  { %v1832_v33 = vpop.permute.xlu1 %1831 }
0x2422   :  { %v1834_v34 = vmul.f32 %v3319_v22, %v1832_v33 }
0x2424   :  { %1836 = vrot.lane.b32.xlu1 %v1834_v34, %s3518_s6 }
0x2496   :  { %v1837_v35 = vpop.permute.xlu1 %1836 }
0x2497   :  { %3111 = vmatmul.mubr.msk.f32.vlgmr.msra.gmra.mxu0 %vm123_vm1, %v1837_v35 }
0x2498   :  { %3125 = vmatpush3.msra.mxu0 %v3738_v23  ;;  %3132 = vmatprep.mubr.msk.f32.mxu0 %vm3516_vm0, %v3515_v1 }
0x2499   :  { %3126 = vmatprep.subr.mxu0 %v3515_v1 }
0x249a   :  { %3127 = vmatpush3.msra.mxu0 %v3740_v24 }
0x249b   :  { %3128 = vmatprep.subr.mxu0 %v3515_v1 }
0x249c   :  { %3129 = vmatpush3.msra.mxu0 %v3744_v25 }
0x249d   :  { %3130 = vmatprep.subr.mxu0 %v3515_v1 }
0x249e   :  { %3131 = vmatpush3.msra.mxu0 %v3748_v26 }
0x249f   :  { %3133 = vmatmul.mubr.msk.f32.vlgmr.msra.gmra.mxu0 %vm123_vm1, %v1837_v35  ;;  %3146 = vmatprep.subr.mxu0 %v3515_v1 }
0x24a0   :  { %3147 = vmatpush3.msra.mxu0 %v3796_v49  ;;  %3154 = vmatprep.mubr.msk.f32.mxu0 %vm3516_vm0, %v3515_v1 }
0x24a1   :  { %3148 = vmatprep.subr.mxu0 %v3515_v1 }
0x24a2   :  { %3149 = vmatpush3.msra.mxu0 %v3798_v50 }
0x24a3   :  { %3150 = vmatprep.subr.mxu0 %v3515_v1 }
0x24a4   :  { %3151 = vmatpush3.msra.mxu0 %v3803_v51 }
0x24a5   :  { %3152 = vmatprep.subr.mxu0 %v3515_v1 }
0x24a6   :  { %3153 = vmatpush3.msra.mxu0 %v3822_v59 }
0x24a7   :  { %3168 = vmatprep.subr.mxu0 %v3515_v1 }
0x2557   :  { %v1906_v36 = vpop.f32.mrf.mxu0 }
0x2558   :  { %v1907_v37 = vadd.f32 %v1906_v36, %v3817_v52 }
0x2559   :  { %v3112_v0 = vpop.f32.mrf.mxu0 }
0x255a   :  { %1911 = vst.msk [vmem:[#allocation15 + $0x20] sm:$0xff] %vm123_vm1, %v1907_v37  ;;  %v1912_v38 = vsel %vm123_vm1, %v1907_v37, -inf }
0x255b   :  { %1913 = vmax.index.xlane.f32.xlu1 %v1912_v38 }
0x255f   :  { %v2065_v39 = vpop.f32.mrf.mxu0 }
0x2561   :  { %v3134_v40 = vpop.f32.mrf.mxu0 }
0x25e4   :  { %v1914_v2 = vpop.xlane.xlu1 %1913 }
0x25e5   :  { %vm1915_vm8 = vcmp.eq.s32.totalorder %v3828_v61, %v1914_v2 }
0x25e6   :  { %v2746_v41 = vsel %vm1915_vm8, 1.0, %v3515_v1 }
0x25e7   :  { %3122 = vmatmul.mubr.msk.f32.vlgmr.msra.gmra.mxu1 %vm123_vm1, %v2746_v41 }
0x25e8   :  { %3136 = vmatpush3.msra.mxu1 %v3764_v42  ;;  %3143 = vmatprep.mubr.msk.f32.mxu1 %vm3516_vm0, %v3515_v1 }
0x25e9   :  { %3137 = vmatprep.subr.mxu1 %v3515_v1 }
0x25ea   :  { %3138 = vmatpush3.msra.mxu1 %v3766_v43 }
0x25eb   :  { %3139 = vmatprep.subr.mxu1 %v3515_v1 }
0x25ec   :  { %3140 = vmatpush3.msra.mxu1 %v3770_v4 }
0x25ed   :  { %3141 = vmatprep.subr.mxu1 %v3515_v1 }
0x25ee   :  { %3142 = vmatpush3.msra.mxu1 %v3774_v44 }
0x25ef   :  { %3157 = vmatprep.subr.mxu1 %v3515_v1 }
0x26a7   :  { %v1987_v46 = vpop.f32.mrf.mxu1 }
0x26a8   :  { %v1998_v47 = vsel %vm1997_vm9, %v1994_v45, %v1987_v46 }
0x26a9   :  { %v2069_v48 = vadd.f32 %v2065_v39, %v1998_v47  ;;  %v3123_v53 = vpop.f32.mrf.mxu1 }
0x26ab   :  { %3322 = vtanh.f32 %v2069_v48  ;;  %v2750_v55 = vmul.f32 -1.442695, %v2069_v48 }
0x26ad   :  { %3324 = vpow2.f32 %v2750_v55 }
0x26b8   :  { %v3323_v54 = vpop.eup %3322 }
0x26b9   :  { %2079 = vrot.lane.b32.xlu0 %v3323_v54, %s3517_s5 }
0x26ba   :  { %v3325_v56 = vpop.eup %3324 }
0x26bb   :  { %v2073_v57 = vadd.f32 1.0, %v3325_v56 }
0x26bd   :  { %3326 = vrcp.f32 %v2073_v57 }
0x26ca   :  { %v3327_v58 = vpop.eup %3326 }
0x26cb   :  { %v2077_v63 = vmul.f32 %v3327_v58, %v3938_v31 }
0x272b   :  { %v2080_v60 = vpop.permute.xlu0 %2079 }
0x272c   :  { %v2082_v62 = vmul.f32 %v3327_v58, %v2080_v60 }
0x272e   :  { %2084 = vrot.lane.b32.xlu0 %v2082_v62, %s3518_s6 }
0x27a0   :  { %v2085_v5 = vpop.permute.xlu0 %2084 }
0x27a1   :  { %v3984_v6 = vadd.f32 %v2085_v5, %v2077_v63 }
0x27a3   :  { %3328 = vtanh.f32 %v3984_v6 }
0x27b0   :  { %v3329_v7 = vpop.eup %3328 }
0x27b1   :  { %2090 = vrot.lane.b32.xlu0 %v3329_v7, %s3517_s5 }
0x2823   :  { %v2091_v8 = vpop.permute.xlu0 %2090 }
0x2824   :  { %v2093_v9 = vmul.f32 %v3327_v58, %v2091_v8 }
0x2826   :  { %2095 = vrot.lane.b32.xlu1 %v2093_v9, %s3518_s6 }
0x2898   :  { %v2096_v10 = vpop.permute.xlu1 %2095 }
0x2899   :  { %3144 = vmatmul.mubr.msk.f32.vlgmr.msra.gmra.mxu1 %vm123_vm1, %v2096_v10 }
0x289a   :  { %3158 = vmatpush3.msra.mxu1 %v3738_v23  ;;  %3165 = vmatprep.mubr.msk.f32.mxu1 %vm3516_vm0, %v3515_v1 }
0x289b   :  { %3159 = vmatprep.subr.mxu1 %v3515_v1 }
0x289c   :  { %3160 = vmatpush3.msra.mxu1 %v3740_v24 }
0x289d   :  { %3161 = vmatprep.subr.mxu1 %v3515_v1 }
0x289e   :  { %3162 = vmatpush3.msra.mxu1 %v3744_v25 }
0x289f   :  { %3163 = vmatprep.subr.mxu1 %v3515_v1 }
0x28a0   :  { %3164 = vmatpush3.msra.mxu1 %v3748_v26 }
0x28a1   :  { %3166 = vmatmul.mubr.msk.f32.vlgmr.msra.gmra.mxu1 %vm123_vm1, %v2096_v10  ;;  %3179 = vmatprep.subr.mxu1 %v3515_v1 }
0x28a2   :  { %3180 = vmatpush3.msra.mxu1 %v3796_v49  ;;  %3187 = vmatprep.mubr.msk.f32.mxu1 %vm3516_vm0, %v3515_v1 }
0x28a3   :  { %3181 = vmatprep.subr.mxu1 %v3515_v1 }
0x28a4   :  { %3182 = vmatpush3.msra.mxu1 %v3798_v50 }
0x28a5   :  { %3183 = vmatprep.subr.mxu1 %v3515_v1 }
0x28a6   :  { %3184 = vmatpush3.msra.mxu1 %v3803_v51 }
0x28a7   :  { %3185 = vmatprep.subr.mxu1 %v3515_v1 }
0x28a8   :  { %3186 = vmatpush3.msra.mxu1 %v3822_v59  ;;  %v2255_v59 = vstv %s2254_s4 }
0x28a9   :  { %3201 = vmatprep.subr.mxu1 %v3515_v1  ;;  %vm2256_vm11 = vcmp.eq.s32.totalorder %v2255_v59, 1 }
0x2959   :  { %v2165_v11 = vpop.f32.mrf.mxu1 }
0x295a   :  { %v2166_v49 = vadd.f32 %v2165_v11, %v3817_v52 }
0x295b   :  { %v3145_v12 = vpop.f32.mrf.mxu1 }
0x295c   :  { %2170 = vst.msk [vmem:[#allocation15 + $0x28] sm:$0xff] %vm123_vm1, %v2166_v49  ;;  %v2171_v13 = vsel %vm123_vm1, %v2166_v49, -inf }
0x295d   :  { %2172 = vmax.index.xlane.f32.xlu0 %v2171_v13 }
0x2961   :  { %v2324_v50 = vpop.f32.mrf.mxu1 }
0x2963   :  { %v3167_v14 = vpop.f32.mrf.mxu1 }
0x29e6   :  { %v2173_v15 = vpop.xlane.xlu0 %2172 }
0x29e7   :  { %vm2174_vm10 = vcmp.eq.s32.totalorder %v3828_v61, %v2173_v15 }
0x29e8   :  { %v2752_v51 = vsel %vm2174_vm10, 1.0, %v3515_v1 }
0x29e9   :  { %3155 = vmatmul.mubr.msk.f32.vlgmr.msra.gmra.mxu0 %vm123_vm1, %v2752_v51 }
0x29ea   :  { %3169 = vmatpush3.msra.mxu0 %v3764_v42  ;;  %3176 = vmatprep.mubr.msk.f32.mxu0 %vm3516_vm0, %v3515_v1 }
0x29eb   :  { %3170 = vmatprep.subr.mxu0 %v3515_v1 }
0x29ec   :  { %3171 = vmatpush3.msra.mxu0 %v3766_v43 }
0x29ed   :  { %3172 = vmatprep.subr.mxu0 %v3515_v1 }
0x29ee   :  { %3173 = vmatpush3.msra.mxu0 %v3770_v4 }
0x29ef   :  { %3174 = vmatprep.subr.mxu0 %v3515_v1 }
0x29f0   :  { %3175 = vmatpush3.msra.mxu0 %v3774_v44 }
0x29f1   :  { %3190 = vmatprep.subr.mxu0 %v3515_v1 }
0x2aa9   :  { %v2246_v17 = vpop.f32.mrf.mxu0 }
0x2aaa   :  { %v2257_v18 = vsel %vm2256_vm11, %v2253_v16, %v2246_v17 }
0x2aab   :  { %v2328_v19 = vadd.f32 %v2324_v50, %v2257_v18  ;;  %v3156_v20 = vpop.f32.mrf.mxu0 }
0x2aad   :  { %3330 = vtanh.f32 %v2328_v19  ;;  %v2756_v22 = vmul.f32 -1.442695, %v2328_v19 }
0x2aaf   :  { %3332 = vpow2.f32 %v2756_v22 }
0x2aba   :  { %v3331_v21 = vpop.eup %3330 }
0x2abb   :  { %2338 = vrot.lane.b32.xlu1 %v3331_v21, %s3517_s5 }
0x2abc   :  { %v3333_v27 = vpop.eup %3332 }
0x2abd   :  { %v2332_v28 = vadd.f32 1.0, %v3333_v27 }
0x2abf   :  { %3334 = vrcp.f32 %v2332_v28 }
0x2acc   :  { %v3335_v29 = vpop.eup %3334 }
0x2acd   :  { %v2336_v32 = vmul.f32 %v3335_v29, %v3984_v6 }
0x2b2d   :  { %v2339_v30 = vpop.permute.xlu1 %2338 }
0x2b2e   :  { %v2341_v31 = vmul.f32 %v3335_v29, %v2339_v30 }
0x2b30   :  { %2343 = vrot.lane.b32.xlu1 %v2341_v31, %s3518_s6 }
0x2ba2   :  { %v2344_v33 = vpop.permute.xlu1 %2343 }
0x2ba3   :  { %v2346_v34 = vadd.f32 %v2344_v33, %v2336_v32 }
0x2ba5   :  { %3336 = vtanh.f32 %v2346_v34 }
0x2bb2   :  { %v3337_v35 = vpop.eup %3336 }
0x2bb3   :  { %2349 = vrot.lane.b32.xlu1 %v3337_v35, %s3517_s5 }
0x2c25   :  { %v2350_v36 = vpop.permute.xlu1 %2349 }
0x2c26   :  { %v2352_v37 = vmul.f32 %v3335_v29, %v2350_v36 }
0x2c28   :  { %2354 = vrot.lane.b32.xlu1 %v2352_v37, %s3518_s6 }
0x2c9a   :  { %v2355_v0 = vpop.permute.xlu1 %2354 }
0x2c9b   :  { %3177 = vmatmul.mubr.msk.f32.vlgmr.msra.gmra.mxu0 %vm123_vm1, %v2355_v0 }
0x2c9c   :  { %3191 = vmatpush3.msra.mxu0 %v3738_v23  ;;  %3198 = vmatprep.mubr.msk.f32.mxu0 %vm3516_vm0, %v3515_v1 }
0x2c9d   :  { %3192 = vmatprep.subr.mxu0 %v3515_v1 }
0x2c9e   :  { %3193 = vmatpush3.msra.mxu0 %v3740_v24 }
0x2c9f   :  { %3194 = vmatprep.subr.mxu0 %v3515_v1 }
0x2ca0   :  { %3195 = vmatpush3.msra.mxu0 %v3744_v25 }
0x2ca1   :  { %3196 = vmatprep.subr.mxu0 %v3515_v1 }
0x2ca2   :  { %3197 = vmatpush3.msra.mxu0 %v3748_v26  ;;  %v2514_v26 = vstv %s2513_s0 }
0x2ca3   :  { %3199 = vmatmul.mubr.msk.f32.vlgmr.msra.gmra.mxu0 %vm123_vm1, %v2355_v0  ;;  %vm2515_vm13 = vcmp.eq.s32.totalorder %v2514_v26, 1 }
0x2d5b   :  { %v2424_v38 = vpop.f32.mrf.mxu0 }
0x2d5c   :  { %v2425_v23 = vadd.f32 %v2424_v38, %v3817_v52 }
0x2d5d   :  { %v3178_v39 = vpop.f32.mrf.mxu0 }
0x2d5e   :  { %2429 = vst.msk [vmem:[#allocation15 + $0x30] sm:$0xff] %vm123_vm1, %v2425_v23  ;;  %v2430_v40 = vsel %vm123_vm1, %v2425_v23, -inf }
0x2d5f   :  { %2431 = vmax.index.xlane.f32.xlu0 %v2430_v40 }
0x2d63   :  { %v2583_v24 = vpop.f32.mrf.mxu0 }
0x2d65   :  { %v3200_v2 = vpop.f32.mrf.mxu0 }
0x2de8   :  { %v2432_v41 = vpop.xlane.xlu0 %2431 }
0x2de9   :  { %vm2433_vm12 = vcmp.eq.s32.totalorder %v3828_v61, %v2432_v41 }
0x2dea   :  { %v2758_v25 = vsel %vm2433_vm12, 1.0, %v3515_v1 }
0x2deb   :  { %3188 = vmatmul.mubr.msk.f32.vlgmr.msra.gmra.mxu1 %vm123_vm1, %v2758_v25 }
0x2dec   :  { %3202 = vmatpush3.msra.mxu1 %v3764_v42  ;;  %3209 = vmatprep.mubr.msk.f32.mxu1 %vm3516_vm0, %v3515_v1  ;;  %v2512_v42 = vld [vmem:[#allocation7 + $0x30] sm:$0xff] }
0x2ded   :  { %3203 = vmatprep.subr.mxu1 %v3515_v1 }
0x2dee   :  { %3204 = vmatpush3.msra.mxu1 %v3766_v43 }
0x2def   :  { %3205 = vmatprep.subr.mxu1 %v3515_v1 }
0x2df0   :  { %3206 = vmatpush3.msra.mxu1 %v3770_v4 }
0x2df1   :  { %3207 = vmatprep.subr.mxu1 %v3515_v1 }
0x2df2   :  { %3208 = vmatpush3.msra.mxu1 %v3774_v44 }
0x2eab   :  { %v2505_v61 = vpop.f32.mrf.mxu1 }
0x2eac   :  { %v2516_v3 = vsel %vm2515_vm13, %v2512_v42, %v2505_v61 }
0x2ead   :  { %v2587_v45 = vadd.f32 %v2583_v24, %v2516_v3  ;;  %v3189_v46 = vpop.f32.mrf.mxu1 }
0x2eaf   :  { %3338 = vtanh.f32 %v2587_v45  ;;  %v2762_v47 = vmul.f32 -1.442695, %v2587_v45 }
0x2eb1   :  { %3340 = vpow2.f32 %v2762_v47 }
0x2ebc   :  { %v3339_v43 = vpop.eup %3338 }
0x2ebd   :  { %2597 = vrot.lane.b32.xlu1 %v3339_v43, %s3517_s5 }
0x2ebe   :  { %v3341_v4 = vpop.eup %3340 }
0x2ebf   :  { %v2591_v1 = vadd.f32 1.0, %v3341_v4 }
0x2ec1   :  { %3342 = vrcp.f32 %v2591_v1 }
0x2ece   :  { %v3343_v44 = vpop.eup %3342 }
0x2ecf   :  { %v2595_v54 = vmul.f32 %v3343_v44, %v2346_v34 }
0x2f2f   :  { %v2598_v48 = vpop.permute.xlu1 %2597 }
0x2f30   :  { %v2600_v53 = vmul.f32 %v3343_v44, %v2598_v48 }
0x2f32   :  { %2602 = vrot.lane.b32.xlu0 %v2600_v53, %s3518_s6 }
0x2fa4   :  { %v2603_v55 = vpop.permute.xlu0 %2602 }
0x2fa5   :  { %v2605_v56 = vadd.f32 %v2603_v55, %v2595_v54 }
0x2fa7   :  { %3344 = vtanh.f32 %v2605_v56 }
0x2fb4   :  { %v3345_v57 = vpop.eup %3344 }
0x2fb5   :  { %2608 = vrot.lane.b32.xlu1 %v3345_v57, %s3517_s5 }
0x3027   :  { %v2609_v58 = vpop.permute.xlu1 %2608 }
0x3028   :  { %v2611_v60 = vmul.f32 %v3343_v44, %v2609_v58 }
0x302a   :  { %2613 = vrot.lane.b32.xlu1 %v2611_v60, %s3518_s6 }
0x309c   :  { %v2614_v62 = vpop.permute.xlu1 %2613 }
0x309d   :  { %3210 = vmatmul.mubr.msk.f32.vlgmr.msra.gmra.mxu1 %vm123_vm1, %v2614_v62 }
0x315d   :  { %v2683_v63 = vpop.f32.mrf.mxu1 }
0x315e   :  { %v2684_v5 = vadd.f32 %v2683_v63, %v3817_v52 }
0x315f   :  { %v3211_v6 = vpop.f32.mrf.mxu1 }
0x3160   :  { %2688 = vst.msk [vmem:[#allocation15 + $0x38] sm:$0xff] %vm123_vm1, %v2684_v5 }
0x3161   :  { %3485 = shalt.err (!%p3482_p12)
}
0x3162   :  { %2700 = dma.vmem_to_hbm [thread:$0]  %s2695_s26, 1024, %s4079_s8, [#allocation4], %s3508_s10, %s3508_s10, %s3509_s11  }
0x3163   :  { %3504 = dma.done.wait [#allocation4], 1024  }
0x3164   :  { %3505 = vsyncadd [#allocation4], 4294966272 }
0x3165   :  { %2704 = vsyncpa [#allocation3], 1 }
0x3166   :  { %2705 = vsyncpa [#allocation8], 1 }
0x3167   :  { %2706 = vsyncpa [#allocation11], 1 }
0x3168   :  { %2707 = vsyncpa [#allocation14], 1 }
0x3169   :  { %2708 = vsyncpa [#allocation4], 1 }
0x316a   :  { %2709 = vsyncpa [#allocation5], 1 }

</bundles_post_ra>
